<compile_context>
chip_gen: v6e
topology: v6e:2x2x1
jax: 0.10.0
libtpu: 0.0.40
codegen_flags: <defaults>
</compile_context>

<pallas_src>
import math
from functools import partial

import jax
import jax.numpy as jnp
import numpy as np
from jax.experimental import pallas as pl
from jax.experimental.pallas import tpu as pltpu

# ----- small, module-consistent hyperparameters -----
IN_DIMS = 8
OUT_DIMS = 8
RES_LAYERS = 4          # residual_layers
RES_CH = 32             # residual_channels
DILATION_CYCLE = 2      # dilation_cycle_length
PE_SCALE = 1.0


# =====================  Pallas kernel  =====================
def _wavnet_kernel(d_ref, x_hbm, c1_hbm, c2_hbm, m_hbm,
                   w_in_ref, b_in_ref,
                   w_fused_ref, b_fused_ref,
                   w_out_ref, b_out_ref,
                   w_skip_ref, b_skip_ref,
                   w_op_ref, b_op_ref,
                   out_ref,
                   xwin_ref, c1win_ref, c2win_ref, mwin_ref, stage_ref, dma_sems,
                   *, n_layers, dilation_cycle, C, TT, H, W, T_valid):
    f32 = jnp.float32
    bf16 = jnp.bfloat16

    b = pl.program_id(0)
    j = pl.program_id(1)
    t0 = pl.multiple_of(j * TT, 128)          # window start in the (padded) HBM arrays

    # ---- fetch the haloed time window of every per-sample input (HBM -> VMEM) ----
    copies = (
        pltpu.make_async_copy(x_hbm.at[b, :, pl.ds(t0, W)], xwin_ref, dma_sems.at[0]),
        pltpu.make_async_copy(c1_hbm.at[b, :, pl.ds(t0, W)], c1win_ref, dma_sems.at[1]),
        pltpu.make_async_copy(c2_hbm.at[b, :, pl.ds(t0, W)], c2win_ref, dma_sems.at[2]),
        pltpu.make_async_copy(m_hbm.at[b, :, pl.ds(t0, W)], mwin_ref, dma_sems.at[3]),
    )
    for cp in copies:
        cp.start()
    for cp in copies:
        cp.wait()

    m_row = mwin_ref[...]                                      # (1, W) f32
    mask2 = jnp.broadcast_to(m_row, (2 * C, W))                # hoisted, reused 2x/layer

    # original-array column index of every lane (handles conv zero-padding + lane pad)
    col_t = jax.lax.broadcasted_iota(jnp.int32, (1, W), 1) + (t0 - H)
    dils = [2 ** (l % dilation_cycle) for l in range(n_layers)]
    lmask = {d: (col_t >= d).astype(f32) for d in sorted(set(dils))}
    rmask = {d: (col_t < (T_valid - d)).astype(f32) for d in sorted(set(dils))}

    # cond1 + cond2 -> loop-invariant bottom quarter of the fused (4C, W) operand
    stage_ref[3 * C:4 * C, :] = (c1win_ref[...].astype(f32)
                                 + c2win_ref[...].astype(f32)).astype(bf16)

    # input_projection (1x1 conv) -> mask -> relu
    x = jnp.dot(w_in_ref[...], xwin_ref[...],
                preferred_element_type=f32) + b_in_ref[...]
    x = jnp.maximum(x * m_row, 0.0)                            # (C, W) f32

    d_steps = d_ref[0]                                         # (C, L) f32
    skip_sum = jnp.zeros((C, W), f32)
    inv_sqrt2 = 1.0 / math.sqrt(2.0)

    for l in range(n_layers):                                  # static unroll
        dil = dils[l]
        y = x + d_steps[:, l:l + 1]                            # (C, W) f32

        # stacked operand [y(t-dil); y(t); y(t+dil)] via XLU rolls + boundary masks
        stage_ref[C:2 * C, :] = y.astype(bf16)
        stage_ref[0:C, :] = (pltpu.roll(y, dil, 1) * lmask[dil]).astype(bf16)
        stage_ref[2 * C:3 * C, :] = (pltpu.roll(y, W - dil, 1) * rmask[dil]).astype(bf16)

        # one K=4C matmul: 3 dilated-conv taps + conditioner projection, fused bias,
        # single mask multiply.
        y2 = jnp.dot(w_fused_ref[l], stage_ref[...],
                     preferred_element_type=f32) + b_fused_ref[l]
        y2 = y2 * mask2                                        # (2C, W) f32

        y3 = jax.nn.sigmoid(y2[:C, :]) * jnp.tanh(y2[C:, :])   # (C, W) f32

        # output_projection (1x1 conv) * mask
        y4 = jnp.dot(w_out_ref[l], y3.astype(bf16),
                     preferred_element_type=f32) + b_out_ref[l]
        y4 = y4 * mask2                                        # (2C, W) f32

        x = (x + y4[:C, :]) * inv_sqrt2
        skip_sum = skip_sum + y4[C:, :]

    xs = skip_sum * (1.0 / math.sqrt(float(n_layers)))
    xs = jnp.dot(w_skip_ref[...], xs.astype(bf16),
                 preferred_element_type=f32) + b_skip_ref[...]
    xs = jnp.maximum(xs * m_row, 0.0)
    out = (jnp.dot(w_op_ref[...], xs.astype(bf16),
                   preferred_element_type=f32) + b_op_ref[...]) * m_row   # (Dout, W)

    # write only the central TT columns (the halo is recomputed by neighbours)
    out_ref[0] = out[:, H:H + TT].astype(out_ref.dtype)


# =====================  wrapper  =====================
def mask_wavnet_pallas(params, x, diffusion_step, cond1, cond2, masks, *, time_tile=1024):
    f32, bf16 = jnp.float32, jnp.bfloat16
    B, Din, T = x.shape
    C = params["w_in"].shape[0]
    L = params["w_dil"].shape[0]
    Dout = params["w_op"].shape[0]

    # --- diffusion embedding + MLP + per-layer projection (tiny, T-independent glue) ---
    half = C // 2
    freq = jnp.exp(jnp.arange(half, dtype=f32) * -(math.log(10000.0) / (half - 1)))
    emb = diffusion_step[:, None].astype(f32) * freq[None, :] * PE_SCALE
    emb = jnp.concatenate([jnp.sin(emb), jnp.cos(emb)], axis=-1)            # (B, C)
    h = emb @ params["w_mlp1"].T + params["b_mlp1"]
    h = h * jnp.tanh(jax.nn.softplus(h))                                    # Mish
    d = h @ params["w_mlp2"].T + params["b_mlp2"]                           # (B, C)
    d_all = jnp.einsum("lij,bj->bil", params["w_diff"], d) + params["b_diff"].T[None]  # (B,C,L)

    # --- fused, lane-dense, bf16 weight layout ---
    w_dil = params["w_dil"]                                                  # (L, 3, 2C, C)
    w_fused = jnp.concatenate([w_dil[:, 0], w_dil[:, 1], w_dil[:, 2],
                               params["w_cnd"]], axis=-1).astype(bf16)       # (L, 2C, 4C)
    b_fused = params["b_dil"] + params["b_cnd"]                              # (L, 2C, 1) f32
    w_in = params["w_in"].astype(bf16)
    w_out = params["w_out"].astype(bf16)
    w_skip = params["w_skip"].astype(bf16)
    w_op = params["w_op"].astype(bf16)

    # --- time geometry: lane-dense tiles + halo = cumulative receptive field ---
    halo_needed = sum(2 ** (l % DILATION_CYCLE) for l in range(L))
    T128 = ((T + 127) // 128) * 128
    TT = max(128, (time_tile // 128) * 128)
    TT = min(TT, T128)
    n_t = -(-T128 // TT)
    T_pad = n_t * TT
    H = 0 if n_t == 1 else 64 * ((halo_needed + 63) // 64)   # keep window width %128 == 0
    W = TT + 2 * H
    T_glob = T_pad + 2 * H

    def pad_t(a, dtype):
        return jnp.pad(a.astype(dtype), ((0, 0), (0, 0), (H, T_glob - H - T)))

    x_p = pad_t(x, bf16)
    c1_p = pad_t(cond1, bf16)
    c2_p = pad_t(cond2, bf16)
    m_p = pad_t(masks, f32)

    grid_spec = pltpu.PrefetchScalarGridSpec(
        num_scalar_prefetch=0,
        grid=(B, n_t),
        in_specs=[
            pl.BlockSpec((1, C, L), lambda b, j: (b, 0, 0)),             # diffusion steps
            pl.BlockSpec(memory_space=pl.ANY),                           # x        (HBM)
            pl.BlockSpec(memory_space=pl.ANY),                           # cond1    (HBM)
            pl.BlockSpec(memory_space=pl.ANY),                           # cond2    (HBM)
            pl.BlockSpec(memory_space=pl.ANY),                           # masks    (HBM)
            pl.BlockSpec((C, Din), lambda b, j: (0, 0)),                 # w_in
            pl.BlockSpec((C, 1), lambda b, j: (0, 0)),                   # b_in
            pl.BlockSpec((L, 2 * C, 4 * C), lambda b, j: (0, 0, 0)),     # w_fused
            pl.BlockSpec((L, 2 * C, 1), lambda b, j: (0, 0, 0)),         # b_fused
            pl.BlockSpec((L, 2 * C, C), lambda b, j: (0, 0, 0)),         # w_out
            pl.BlockSpec((L, 2 * C, 1), lambda b, j: (0, 0, 0)),         # b_out
            pl.BlockSpec((C, C), lambda b, j: (0, 0)),                   # w_skip
            pl.BlockSpec((C, 1), lambda b, j: (0, 0)),                   # b_skip
            pl.BlockSpec((Dout, C), lambda b, j: (0, 0)),                # w_op
            pl.BlockSpec((Dout, 1), lambda b, j: (0, 0)),                # b_op
        ],
        out_specs=pl.BlockSpec((1, Dout, TT), lambda b, j: (b, 0, j)),   # lane-dense out
        scratch_shapes=[
            pltpu.VMEM((Din, W), bf16),            # x window
            pltpu.VMEM((C, W), bf16),              # cond1 window
            pltpu.VMEM((C, W), bf16),              # cond2 window
            pltpu.VMEM((1, W), f32),               # mask window
            pltpu.VMEM((4 * C, W), bf16),          # fused matmul operand staging
            pltpu.SemaphoreType.DMA((4,)),
        ],
    )

    flops = 2 * B * T_pad * (L * (2 * C * 4 * C + 2 * C * C)
                             + C * Din + C * C + Dout * C)
    cost = pl.CostEstimate(
        flops=int(flops),
        transcendentals=int(2 * B * T_pad * L * C),
        bytes_accessed=int(x_p.size * 2 + c1_p.size * 2 + c2_p.size * 2 + m_p.size * 4
                           + B * Dout * T_pad * 4 + w_fused.size * 2 + w_out.size * 2
                           + d_all.size * 4),
    )

    out_padded = pl.pallas_call(
        partial(_wavnet_kernel, n_layers=L, dilation_cycle=DILATION_CYCLE,
                C=C, TT=TT, H=H, W=W, T_valid=T),
        out_shape=jax.ShapeDtypeStruct((B, Dout, T_pad), f32),
        grid_spec=grid_spec,
        compiler_params=pltpu.CompilerParams(
            dimension_semantics=("parallel", "parallel")),
        cost_estimate=cost,
    )(d_all, x_p, c1_p, c2_p, m_p,
      w_in, params["b_in"], w_fused, b_fused,
      w_out, params["b_out"], w_skip, params["b_skip"],
      w_op, params["b_op"])

    return out_padded[:, :, :T]


# =====================  deterministic parameter init  =====================
def init_params(key):
    keys = jax.random.split(key, 20)
    C, L = RES_CH, RES_LAYERS

    def kai(k, shape, fan_in):  # kaiming-normal-ish
        return jax.random.normal(k, shape, jnp.float32) * math.sqrt(2.0 / fan_in)

    p = {}
    p["w_in"] = kai(keys[0], (C, IN_DIMS), IN_DIMS)
    p["b_in"] = 0.02 * jax.random.normal(keys[1], (C, 1), jnp.float32)
    p["w_mlp1"] = kai(keys[2], (4 * C, C), C)
    p["b_mlp1"] = 0.02 * jax.random.normal(keys[3], (4 * C,), jnp.float32)
    p["w_mlp2"] = kai(keys[4], (C, 4 * C), 4 * C)
    p["b_mlp2"] = 0.02 * jax.random.normal(keys[5], (C,), jnp.float32)
    p["w_diff"] = kai(keys[6], (L, C, C), C)
    p["b_diff"] = 0.02 * jax.random.normal(keys[7], (L, C), jnp.float32)
    p["w_dil"] = kai(keys[8], (L, 3, 2 * C, C), 3 * C)          # taps-major layout
    p["b_dil"] = 0.02 * jax.random.normal(keys[9], (L, 2 * C, 1), jnp.float32)
    p["w_cnd"] = kai(keys[10], (L, 2 * C, C), C)
    p["b_cnd"] = 0.02 * jax.random.normal(keys[11], (L, 2 * C, 1), jnp.float32)
    p["w_out"] = kai(keys[12], (L, 2 * C, C), C)
    p["b_out"] = 0.02 * jax.random.normal(keys[13], (L, 2 * C, 1), jnp.float32)
    p["w_skip"] = kai(keys[14], (C, C), C)
    p["b_skip"] = 0.02 * jax.random.normal(keys[15], (C, 1), jnp.float32)
    # NOTE: the PyTorch module zero-inits output_projection.weight; small random values
    # are used so the whole compute path is exercised (forward semantics identical).
    p["w_op"] = 0.1 * kai(keys[16], (OUT_DIMS, C), C)
    p["b_op"] = 0.02 * jax.random.normal(keys[17], (OUT_DIMS, 1), jnp.float32)
    return p


# =====================  pure-JAX reference (for verification)  =====================
def mask_wavnet_ref(params, x, diffusion_step, cond1, cond2, masks):
    cond = cond1 + cond2
    C = RES_CH
    B, _, T = x.shape
    half = C // 2
    freq = jnp.exp(jnp.arange(half, dtype=jnp.float32) * -(math.log(10000.0) / (half - 1)))
    emb = diffusion_step[:, None] * freq[None, :] * PE_SCALE
    emb = jnp.concatenate([jnp.sin(emb), jnp.cos(emb)], axis=-1)
    h = emb @ params["w_mlp1"].T + params["b_mlp1"]
    h = h * jnp.tanh(jax.nn.softplus(h))
    d = h @ params["w_mlp2"].T + params["b_mlp2"]                       # (B, C)

    def conv1x1(w, b, v):
        return jnp.einsum("oi,bit->bot", w, v) + b[None]

    xh = jax.nn.relu(conv1x1(params["w_in"], params["b_in"], x) * masks)
    skip_sum = jnp.zeros((B, C, T), jnp.float32)
    for l in range(RES_LAYERS):
        dil = 2 ** (l % DILATION_CYCLE)
        dproj = d @ params["w_diff"][l].T + params["b_diff"][l]
        y = xh + dproj[:, :, None]
        yp = jnp.pad(y, ((0, 0), (0, 0), (dil, dil)))
        conv = (jnp.einsum("oi,bit->bot", params["w_dil"][l, 0], yp[:, :, :T])
                + jnp.einsum("oi,bit->bot", params["w_dil"][l, 1], yp[:, :, dil:dil + T])
                + jnp.einsum("oi,bit->bot", params["w_dil"][l, 2], yp[:, :, 2 * dil:2 * dil + T])
                + params["b_dil"][l][None])
        cnd = conv1x1(params["w_cnd"][l], params["b_cnd"][l], cond) * masks
        y2 = conv * masks + cnd
        gate, filt = y2[:, :C], y2[:, C:]
        y3 = jax.nn.sigmoid(gate) * jnp.tanh(filt)
        y4 = conv1x1(params["w_out"][l], params["b_out"][l], y3) * masks
        residual, skip = y4[:, :C], y4[:, C:]
        xh = (xh + residual) / math.sqrt(2.0)
        skip_sum = skip_sum + skip
    xs = skip_sum / math.sqrt(float(RES_LAYERS))
    xs = jax.nn.relu(conv1x1(params["w_skip"], params["b_skip"], xs) * masks)
    return conv1x1(params["w_op"], params["b_op"], xs) * masks


if __name__ == "__main__":
    key = jax.random.PRNGKey(0)
    kp, kx, kc1, kc2, kd = jax.random.split(key, 5)
    B, T = 2, 16

    params = init_params(kp)
    x = jax.random.normal(kx, (B, IN_DIMS, T), jnp.float32)
    cond1 = jax.random.normal(kc1, (B, RES_CH, T), jnp.float32)
    cond2 = jax.random.normal(kc2, (B, RES_CH, T), jnp.float32)
    diffusion_step = jax.random.uniform(kd, (B,), jnp.float32, 0.0, 100.0)
    lens = jnp.array([T, T - 6])
    masks = (jnp.arange(T)[None, :] < lens[:, None]).astype(jnp.float32)[:, None, :]  # (B,1,T)

    out = jax.block_until_ready(
        mask_wavnet_pallas(params, x, diffusion_step, cond1, cond2, masks))
    ref = jax.block_until_ready(
        mask_wavnet_ref(params, x, diffusion_step, cond1, cond2, masks))
    assert out.shape == (B, OUT_DIMS, T)
    # bf16 matmul operands vs f32 reference
    np.testing.assert_allclose(np.asarray(out), np.asarray(ref), rtol=5e-2, atol=2e-2)

    # Second case: exercises the time-tiled (haloed-window, multi-grid-step) path.
    k2 = jax.random.split(key, 9)
    B2, T2 = 1, 300
    x2 = jax.random.normal(k2[5], (B2, IN_DIMS, T2), jnp.float32)
    c21 = jax.random.normal(k2[6], (B2, RES_CH, T2), jnp.float32)
    c22 = jax.random.normal(k2[7], (B2, RES_CH, T2), jnp.float32)
    ds2 = jax.random.uniform(k2[8], (B2,), jnp.float32, 0.0, 100.0)
    m2 = (jnp.arange(T2)[None, :] < 250).astype(jnp.float32)[:, None, :]   # (1,1,T2)

    out2 = jax.block_until_ready(
        mask_wavnet_pallas(params, x2, ds2, c21, c22, m2, time_tile=128))
    ref2 = jax.block_until_ready(mask_wavnet_ref(params, x2, ds2, c21, c22, m2))
    assert out2.shape == (B2, OUT_DIMS, T2)
    np.testing.assert_allclose(np.asarray(out2), np.asarray(ref2), rtol=5e-2, atol=2e-2)

    print("KERNEL_OK")
</pallas_src>

<mosaic_0001>
module attributes {stable_mosaic.version = 11 : i64} {
  func.func @_wavnet_kernel(%arg0: i32, %arg1: i32, %arg2: memref<1x32x4xf32, #tpu.memory_space<vmem>>, %arg3: memref<2x8x128xbf16, #tpu.memory_space<any>>, %arg4: memref<2x32x128xbf16, #tpu.memory_space<any>>, %arg5: memref<2x32x128xbf16, #tpu.memory_space<any>>, %arg6: memref<2x1x128xf32, #tpu.memory_space<any>>, %arg7: memref<32x8xbf16, #tpu.memory_space<vmem>>, %arg8: memref<32x1xf32, #tpu.memory_space<vmem>>, %arg9: memref<4x64x128xbf16, #tpu.memory_space<vmem>>, %arg10: memref<4x64x1xf32, #tpu.memory_space<vmem>>, %arg11: memref<4x64x32xbf16, #tpu.memory_space<vmem>>, %arg12: memref<4x64x1xf32, #tpu.memory_space<vmem>>, %arg13: memref<32x32xbf16, #tpu.memory_space<vmem>>, %arg14: memref<32x1xf32, #tpu.memory_space<vmem>>, %arg15: memref<8x32xbf16, #tpu.memory_space<vmem>>, %arg16: memref<8x1xf32, #tpu.memory_space<vmem>>, %arg17: memref<1x8x128xf32, #tpu.memory_space<vmem>>, %arg18: memref<8x128xbf16, #tpu.memory_space<vmem>>, %arg19: memref<32x128xbf16, #tpu.memory_space<vmem>>, %arg20: memref<32x128xbf16, #tpu.memory_space<vmem>>, %arg21: memref<1x128xf32, #tpu.memory_space<vmem>>, %arg22: memref<128x128xbf16, #tpu.memory_space<vmem>>, %arg23: memref<4x!tpu.dma_semaphore, #tpu.memory_space<semaphore_mem>>) attributes {dimension_semantics = [#tpu.dimension_semantics<parallel>, #tpu.dimension_semantics<parallel>], iteration_bounds = array<i64: 2, 1>, scalar_prefetch = 0 : i64, scratch_operands = 6 : i64, tpu.core_type = #tpu.core_type<tc>, window_params = [{transform_indices = @transform_0, window_bounds = array<i64: 1, 32, 4>}, {}, {}, {}, {}, {pipeline_mode = #tpu.pipeline_mode<synchronous>, transform_indices = @transform_5, window_bounds = array<i64: 32, 8>}, {pipeline_mode = #tpu.pipeline_mode<synchronous>, transform_indices = @transform_6, window_bounds = array<i64: 32, 1>}, {pipeline_mode = #tpu.pipeline_mode<synchronous>, transform_indices = @transform_7, window_bounds = array<i64: 4, 64, 128>}, {pipeline_mode = #tpu.pipeline_mode<synchronous>, transform_indices = @transform_8, window_bounds = array<i64: 4, 64, 1>}, {pipeline_mode = #tpu.pipeline_mode<synchronous>, transform_indices = @transform_9, window_bounds = array<i64: 4, 64, 32>}, {pipeline_mode = #tpu.pipeline_mode<synchronous>, transform_indices = @transform_10, window_bounds = array<i64: 4, 64, 1>}, {pipeline_mode = #tpu.pipeline_mode<synchronous>, transform_indices = @transform_11, window_bounds = array<i64: 32, 32>}, {pipeline_mode = #tpu.pipeline_mode<synchronous>, transform_indices = @transform_12, window_bounds = array<i64: 32, 1>}, {pipeline_mode = #tpu.pipeline_mode<synchronous>, transform_indices = @transform_13, window_bounds = array<i64: 8, 32>}, {pipeline_mode = #tpu.pipeline_mode<synchronous>, transform_indices = @transform_14, window_bounds = array<i64: 8, 1>}, {transform_indices = @transform_15, window_bounds = array<i64: 1, 8, 128>}]} {
    %c128_i32 = arith.constant 128 : i32
    %0 = arith.muli %arg1, %c128_i32 : i32
    %1 = tpu.assume_multiple %0, 128 : i32
    %c0_i32 = arith.constant 0 : i32
    %c0_i32_0 = arith.constant 0 : i32
    %2 = tpu.memref_slice %arg3[%arg0, %c0_i32_0, %1] : memref<2x8x128xbf16, #tpu.memory_space<any>> -> memref<1x8x128xbf16, #tpu.memory_space<any>>
    %3 = tpu.memref_squeeze %2 : memref<1x8x128xbf16, #tpu.memory_space<any>> -> memref<8x128xbf16, #tpu.memory_space<any>>
    %4 = tpu.memref_slice %arg23[%c0_i32] : memref<4x!tpu.dma_semaphore, #tpu.memory_space<semaphore_mem>> -> memref<1x!tpu.dma_semaphore, #tpu.memory_space<semaphore_mem>>
    %5 = tpu.memref_squeeze %4 : memref<1x!tpu.dma_semaphore, #tpu.memory_space<semaphore_mem>> -> memref<!tpu.dma_semaphore, #tpu.memory_space<semaphore_mem>>
    tpu.enqueue_dma source(%3 : memref<8x128xbf16, #tpu.memory_space<any>>) target(%arg18 : memref<8x128xbf16, #tpu.memory_space<vmem>>) target_semaphore(%5 : memref<!tpu.dma_semaphore, #tpu.memory_space<semaphore_mem>>)
    %c1_i32 = arith.constant 1 : i32
    %c0_i32_1 = arith.constant 0 : i32
    %6 = tpu.memref_slice %arg4[%arg0, %c0_i32_1, %1] : memref<2x32x128xbf16, #tpu.memory_space<any>> -> memref<1x32x128xbf16, #tpu.memory_space<any>>
    %7 = tpu.memref_squeeze %6 : memref<1x32x128xbf16, #tpu.memory_space<any>> -> memref<32x128xbf16, #tpu.memory_space<any>>
    %8 = tpu.memref_slice %arg23[%c1_i32] : memref<4x!tpu.dma_semaphore, #tpu.memory_space<semaphore_mem>> -> memref<1x!tpu.dma_semaphore, #tpu.memory_space<semaphore_mem>>
    %9 = tpu.memref_squeeze %8 : memref<1x!tpu.dma_semaphore, #tpu.memory_space<semaphore_mem>> -> memref<!tpu.dma_semaphore, #tpu.memory_space<semaphore_mem>>
    tpu.enqueue_dma source(%7 : memref<32x128xbf16, #tpu.memory_space<any>>) target(%arg19 : memref<32x128xbf16, #tpu.memory_space<vmem>>) target_semaphore(%9 : memref<!tpu.dma_semaphore, #tpu.memory_space<semaphore_mem>>)
    %c2_i32 = arith.constant 2 : i32
    %c0_i32_2 = arith.constant 0 : i32
    %10 = tpu.memref_slice %arg5[%arg0, %c0_i32_2, %1] : memref<2x32x128xbf16, #tpu.memory_space<any>> -> memref<1x32x128xbf16, #tpu.memory_space<any>>
    %11 = tpu.memref_squeeze %10 : memref<1x32x128xbf16, #tpu.memory_space<any>> -> memref<32x128xbf16, #tpu.memory_space<any>>
    %12 = tpu.memref_slice %arg23[%c2_i32] : memref<4x!tpu.dma_semaphore, #tpu.memory_space<semaphore_mem>> -> memref<1x!tpu.dma_semaphore, #tpu.memory_space<semaphore_mem>>
    %13 = tpu.memref_squeeze %12 : memref<1x!tpu.dma_semaphore, #tpu.memory_space<semaphore_mem>> -> memref<!tpu.dma_semaphore, #tpu.memory_space<semaphore_mem>>
    tpu.enqueue_dma source(%11 : memref<32x128xbf16, #tpu.memory_space<any>>) target(%arg20 : memref<32x128xbf16, #tpu.memory_space<vmem>>) target_semaphore(%13 : memref<!tpu.dma_semaphore, #tpu.memory_space<semaphore_mem>>)
    %c3_i32 = arith.constant 3 : i32
    %c0_i32_3 = arith.constant 0 : i32
    %14 = tpu.memref_slice %arg6[%arg0, %c0_i32_3, %1] : memref<2x1x128xf32, #tpu.memory_space<any>> -> memref<1x1x128xf32, #tpu.memory_space<any>>
    %15 = tpu.memref_squeeze %14 : memref<1x1x128xf32, #tpu.memory_space<any>> -> memref<1x128xf32, #tpu.memory_space<any>>
    %16 = tpu.memref_slice %arg23[%c3_i32] : memref<4x!tpu.dma_semaphore, #tpu.memory_space<semaphore_mem>> -> memref<1x!tpu.dma_semaphore, #tpu.memory_space<semaphore_mem>>
    %17 = tpu.memref_squeeze %16 : memref<1x!tpu.dma_semaphore, #tpu.memory_space<semaphore_mem>> -> memref<!tpu.dma_semaphore, #tpu.memory_space<semaphore_mem>>
    tpu.enqueue_dma source(%15 : memref<1x128xf32, #tpu.memory_space<any>>) target(%arg21 : memref<1x128xf32, #tpu.memory_space<vmem>>) target_semaphore(%17 : memref<!tpu.dma_semaphore, #tpu.memory_space<semaphore_mem>>)
    %c0_i32_4 = arith.constant 0 : i32
    %c0_i32_5 = arith.constant 0 : i32
    %18 = tpu.memref_slice %arg3[%arg0, %c0_i32_5, %1] : memref<2x8x128xbf16, #tpu.memory_space<any>> -> memref<1x8x128xbf16, #tpu.memory_space<any>>
    %19 = tpu.memref_squeeze %18 : memref<1x8x128xbf16, #tpu.memory_space<any>> -> memref<8x128xbf16, #tpu.memory_space<any>>
    %20 = tpu.memref_slice %arg23[%c0_i32_4] : memref<4x!tpu.dma_semaphore, #tpu.memory_space<semaphore_mem>> -> memref<1x!tpu.dma_semaphore, #tpu.memory_space<semaphore_mem>>
    %21 = tpu.memref_squeeze %20 : memref<1x!tpu.dma_semaphore, #tpu.memory_space<semaphore_mem>> -> memref<!tpu.dma_semaphore, #tpu.memory_space<semaphore_mem>>
    tpu.wait_dma2 semaphore(%21 : memref<!tpu.dma_semaphore, #tpu.memory_space<semaphore_mem>>) src(%19 : memref<8x128xbf16, #tpu.memory_space<any>>) dst(%arg18 : memref<8x128xbf16, #tpu.memory_space<vmem>>)
    %c1_i32_6 = arith.constant 1 : i32
    %c0_i32_7 = arith.constant 0 : i32
    %22 = tpu.memref_slice %arg4[%arg0, %c0_i32_7, %1] : memref<2x32x128xbf16, #tpu.memory_space<any>> -> memref<1x32x128xbf16, #tpu.memory_space<any>>
    %23 = tpu.memref_squeeze %22 : memref<1x32x128xbf16, #tpu.memory_space<any>> -> memref<32x128xbf16, #tpu.memory_space<any>>
    %24 = tpu.memref_slice %arg23[%c1_i32_6] : memref<4x!tpu.dma_semaphore, #tpu.memory_space<semaphore_mem>> -> memref<1x!tpu.dma_semaphore, #tpu.memory_space<semaphore_mem>>
    %25 = tpu.memref_squeeze %24 : memref<1x!tpu.dma_semaphore, #tpu.memory_space<semaphore_mem>> -> memref<!tpu.dma_semaphore, #tpu.memory_space<semaphore_mem>>
    tpu.wait_dma2 semaphore(%25 : memref<!tpu.dma_semaphore, #tpu.memory_space<semaphore_mem>>) src(%23 : memref<32x128xbf16, #tpu.memory_space<any>>) dst(%arg19 : memref<32x128xbf16, #tpu.memory_space<vmem>>)
    %c2_i32_8 = arith.constant 2 : i32
    %c0_i32_9 = arith.constant 0 : i32
    %26 = tpu.memref_slice %arg5[%arg0, %c0_i32_9, %1] : memref<2x32x128xbf16, #tpu.memory_space<any>> -> memref<1x32x128xbf16, #tpu.memory_space<any>>
    %27 = tpu.memref_squeeze %26 : memref<1x32x128xbf16, #tpu.memory_space<any>> -> memref<32x128xbf16, #tpu.memory_space<any>>
    %28 = tpu.memref_slice %arg23[%c2_i32_8] : memref<4x!tpu.dma_semaphore, #tpu.memory_space<semaphore_mem>> -> memref<1x!tpu.dma_semaphore, #tpu.memory_space<semaphore_mem>>
    %29 = tpu.memref_squeeze %28 : memref<1x!tpu.dma_semaphore, #tpu.memory_space<semaphore_mem>> -> memref<!tpu.dma_semaphore, #tpu.memory_space<semaphore_mem>>
    tpu.wait_dma2 semaphore(%29 : memref<!tpu.dma_semaphore, #tpu.memory_space<semaphore_mem>>) src(%27 : memref<32x128xbf16, #tpu.memory_space<any>>) dst(%arg20 : memref<32x128xbf16, #tpu.memory_space<vmem>>)
    %c3_i32_10 = arith.constant 3 : i32
    %c0_i32_11 = arith.constant 0 : i32
    %30 = tpu.memref_slice %arg6[%arg0, %c0_i32_11, %1] : memref<2x1x128xf32, #tpu.memory_space<any>> -> memref<1x1x128xf32, #tpu.memory_space<any>>
    %31 = tpu.memref_squeeze %30 : memref<1x1x128xf32, #tpu.memory_space<any>> -> memref<1x128xf32, #tpu.memory_space<any>>
    %32 = tpu.memref_slice %arg23[%c3_i32_10] : memref<4x!tpu.dma_semaphore, #tpu.memory_space<semaphore_mem>> -> memref<1x!tpu.dma_semaphore, #tpu.memory_space<semaphore_mem>>
    %33 = tpu.memref_squeeze %32 : memref<1x!tpu.dma_semaphore, #tpu.memory_space<semaphore_mem>> -> memref<!tpu.dma_semaphore, #tpu.memory_space<semaphore_mem>>
    tpu.wait_dma2 semaphore(%33 : memref<!tpu.dma_semaphore, #tpu.memory_space<semaphore_mem>>) src(%31 : memref<1x128xf32, #tpu.memory_space<any>>) dst(%arg21 : memref<1x128xf32, #tpu.memory_space<vmem>>)
    %c0 = arith.constant 0 : index
    %c0_12 = arith.constant 0 : index
    %34 = vector.load %arg21[%c0, %c0_12] : memref<1x128xf32, #tpu.memory_space<vmem>>, vector<1x128xf32>
    %35 = vector.shape_cast %34 : vector<1x128xf32> to vector<1x128xf32>
    %36 = vector.broadcast %35 : vector<1x128xf32> to vector<64x128xf32>
    %37 = tpu.iota {dimensions = array<i32: 1>} : vector<1x128xi32>
    %c0_i32_13 = arith.constant 0 : i32
    %38 = arith.subi %1, %c0_i32_13 : i32
    %39 = vector.broadcast %38 : i32 to vector<1x128xi32>
    %40 = arith.addi %37, %39 : vector<1x128xi32>
    %c1_i32_14 = arith.constant 1 : i32
    %41 = vector.broadcast %c1_i32_14 : i32 to vector<1x128xi32>
    %42 = arith.cmpi sge, %40, %41 : vector<1x128xi32>
    %43 = arith.extui %42 : vector<1x128xi1> to vector<1x128xi32>
    %44 = arith.sitofp %43 : vector<1x128xi32> to vector<1x128xf32>
    %c2_i32_15 = arith.constant 2 : i32
    %45 = vector.broadcast %c2_i32_15 : i32 to vector<1x128xi32>
    %46 = arith.cmpi sge, %40, %45 : vector<1x128xi32>
    %47 = arith.extui %46 : vector<1x128xi1> to vector<1x128xi32>
    %48 = arith.sitofp %47 : vector<1x128xi32> to vector<1x128xf32>
    %c15_i32 = arith.constant 15 : i32
    %49 = vector.broadcast %c15_i32 : i32 to vector<1x128xi32>
    %50 = arith.cmpi slt, %40, %49 : vector<1x128xi32>
    %51 = arith.extui %50 : vector<1x128xi1> to vector<1x128xi32>
    %52 = arith.sitofp %51 : vector<1x128xi32> to vector<1x128xf32>
    %c14_i32 = arith.constant 14 : i32
    %53 = vector.broadcast %c14_i32 : i32 to vector<1x128xi32>
    %54 = arith.cmpi slt, %40, %53 : vector<1x128xi32>
    %55 = arith.extui %54 : vector<1x128xi1> to vector<1x128xi32>
    %56 = arith.sitofp %55 : vector<1x128xi32> to vector<1x128xf32>
    %c0_16 = arith.constant 0 : index
    %c0_17 = arith.constant 0 : index
    %57 = vector.load %arg19[%c0_16, %c0_17] : memref<32x128xbf16, #tpu.memory_space<vmem>>, vector<32x128xbf16>
    %58 = arith.extf %57 : vector<32x128xbf16> to vector<32x128xf32>
    %c0_18 = arith.constant 0 : index
    %c0_19 = arith.constant 0 : index
    %59 = vector.load %arg20[%c0_18, %c0_19] : memref<32x128xbf16, #tpu.memory_space<vmem>>, vector<32x128xbf16>
    %60 = arith.extf %59 : vector<32x128xbf16> to vector<32x128xf32>
    %61 = arith.addf %58, %60 : vector<32x128xf32>
    %62 = arith.truncf %61 : vector<32x128xf32> to vector<32x128xbf16>
    %c96 = arith.constant 96 : index
    %c0_20 = arith.constant 0 : index
    %63 = vector.load %arg22[%c96, %c0_20] : memref<128x128xbf16, #tpu.memory_space<vmem>>, vector<32x128xbf16>
    tpu.vector_store %arg22[%c96, %c0_20], %62 {strides = array<i32>} : memref<128x128xbf16, #tpu.memory_space<vmem>>, vector<32x128xbf16>,
    %c0_21 = arith.constant 0 : index
    %c0_22 = arith.constant 0 : index
    %64 = vector.load %arg7[%c0_21, %c0_22] : memref<32x8xbf16, #tpu.memory_space<vmem>>, vector<32x8xbf16>
    %c0_23 = arith.constant 0 : index
    %c0_24 = arith.constant 0 : index
    %65 = vector.load %arg18[%c0_23, %c0_24] : memref<8x128xbf16, #tpu.memory_space<vmem>>, vector<8x128xbf16>
    %cst = arith.constant dense<0.000000e+00> : vector<32x128xf32>
    %66 = tpu.matmul %64, %65, %cst {dimension_numbers = #tpu.dot_dimension_numbers<[1], [0], [0], [1], [0, 0, 1, 1], [], []>} : vector<32x8xbf16>, vector<8x128xbf16>, vector<32x128xf32> -> vector<32x128xf32>
    %c0_25 = arith.constant 0 : index
    %c0_26 = arith.constant 0 : index
    %67 = vector.load %arg8[%c0_25, %c0_26] : memref<32x1xf32, #tpu.memory_space<vmem>>, vector<32x1xf32>
    %68 = vector.broadcast %67 : vector<32x1xf32> to vector<32x128xf32>
    %69 = arith.addf %66, %68 : vector<32x128xf32>
    %70 = vector.broadcast %34 : vector<1x128xf32> to vector<32x128xf32>
    %71 = arith.mulf %69, %70 : vector<32x128xf32>
    %cst_27 = arith.constant 0.000000e+00 : f32
    %72 = vector.broadcast %cst_27 : f32 to vector<32x128xf32>
    %73 = arith.maximumf %71, %72 : vector<32x128xf32>
    %c0_28 = arith.constant 0 : index
    %c0_29 = arith.constant 0 : index
    %c0_30 = arith.constant 0 : index
    %74 = vector.load %arg2[%c0_28, %c0_29, %c0_30] : memref<1x32x4xf32, #tpu.memory_space<vmem>>, vector<1x32x4xf32>
    %75 = vector.shape_cast %74 : vector<1x32x4xf32> to vector<32x4xf32>
    %cst_31 = arith.constant 0.000000e+00 : f32
    %76 = vector.broadcast %cst_31 : f32 to vector<32x128xf32>
    %77 = vector.extract_strided_slice %75 {offsets = [0, 0], sizes = [32, 1], strides = [1, 1]} : vector<32x4xf32> to vector<32x1xf32>
    %78 = vector.broadcast %77 : vector<32x1xf32> to vector<32x128xf32>
    %79 = arith.addf %73, %78 : vector<32x128xf32>
    %80 = arith.truncf %79 : vector<32x128xf32> to vector<32x128xbf16>
    %c32 = arith.constant 32 : index
    %c0_32 = arith.constant 0 : index
    %81 = vector.load %arg22[%c32, %c0_32] : memref<128x128xbf16, #tpu.memory_space<vmem>>, vector<32x128xbf16>
    tpu.vector_store %arg22[%c32, %c0_32], %80 {strides = array<i32>} : memref<128x128xbf16, #tpu.memory_space<vmem>>, vector<32x128xbf16>,
    %c1_i32_33 = arith.constant 1 : i32
    %82 = tpu.dynamic_rotate %79 by %c1_i32_33 dim 1 : vector<32x128xf32>, i32 -> vector<32x128xf32>
    %83 = vector.broadcast %44 : vector<1x128xf32> to vector<32x128xf32>
    %84 = arith.mulf %82, %83 : vector<32x128xf32>
    %85 = arith.truncf %84 : vector<32x128xf32> to vector<32x128xbf16>
    %c0_34 = arith.constant 0 : index
    %c0_35 = arith.constant 0 : index
    %86 = vector.load %arg22[%c0_34, %c0_35] : memref<128x128xbf16, #tpu.memory_space<vmem>>, vector<32x128xbf16>
    tpu.vector_store %arg22[%c0_34, %c0_35], %85 {strides = array<i32>} : memref<128x128xbf16, #tpu.memory_space<vmem>>, vector<32x128xbf16>,
    %c127_i32 = arith.constant 127 : i32
    %87 = tpu.dynamic_rotate %79 by %c127_i32 dim 1 : vector<32x128xf32>, i32 -> vector<32x128xf32>
    %88 = vector.broadcast %52 : vector<1x128xf32> to vector<32x128xf32>
    %89 = arith.mulf %87, %88 : vector<32x128xf32>
    %90 = arith.truncf %89 : vector<32x128xf32> to vector<32x128xbf16>
    %c64 = arith.constant 64 : index
    %c0_36 = arith.constant 0 : index
    %91 = vector.load %arg22[%c64, %c0_36] : memref<128x128xbf16, #tpu.memory_space<vmem>>, vector<32x128xbf16>
    tpu.vector_store %arg22[%c64, %c0_36], %90 {strides = array<i32>} : memref<128x128xbf16, #tpu.memory_space<vmem>>, vector<32x128xbf16>,
    %c0_37 = arith.constant 0 : index
    %c0_38 = arith.constant 0 : index
    %c0_39 = arith.constant 0 : index
    %92 = vector.load %arg9[%c0_37, %c0_38, %c0_39] : memref<4x64x128xbf16, #tpu.memory_space<vmem>>, vector<1x64x128xbf16>
    %93 = vector.shape_cast %92 : vector<1x64x128xbf16> to vector<64x128xbf16>
    %c0_40 = arith.constant 0 : index
    %c0_41 = arith.constant 0 : index
    %94 = vector.load %arg22[%c0_40, %c0_41] : memref<128x128xbf16, #tpu.memory_space<vmem>>, vector<128x128xbf16>
    %cst_42 = arith.constant dense<0.000000e+00> : vector<64x128xf32>
    %95 = tpu.matmul %93, %94, %cst_42 {dimension_numbers = #tpu.dot_dimension_numbers<[1], [0], [0], [1], [0, 0, 1, 1], [], []>} : vector<64x128xbf16>, vector<128x128xbf16>, vector<64x128xf32> -> vector<64x128xf32>
    %c0_43 = arith.constant 0 : index
    %c0_44 = arith.constant 0 : index
    %c0_45 = arith.constant 0 : index
    %96 = vector.load %arg10[%c0_43, %c0_44, %c0_45] : memref<4x64x1xf32, #tpu.memory_space<vmem>>, vector<1x64x1xf32>
    %97 = vector.shape_cast %96 : vector<1x64x1xf32> to vector<64x1xf32>
    %98 = vector.broadcast %97 : vector<64x1xf32> to vector<64x128xf32>
    %99 = arith.addf %95, %98 : vector<64x128xf32>
    %100 = arith.mulf %99, %36 : vector<64x128xf32>
    %101 = vector.extract_strided_slice %100 {offsets = [0, 0], sizes = [32, 128], strides = [1, 1]} : vector<64x128xf32> to vector<32x128xf32>
    %102 = arith.negf %101 : vector<32x128xf32>
    %103 = math.exp %102 : vector<32x128xf32>
    %cst_46 = arith.constant 1.000000e+00 : f32
    %104 = vector.broadcast %cst_46 : f32 to vector<32x128xf32>
    %105 = arith.addf %104, %103 : vector<32x128xf32>
    %106 = arith.divf %104, %105 : vector<32x128xf32>
    %107 = vector.extract_strided_slice %100 {offsets = [32, 0], sizes = [32, 128], strides = [1, 1]} : vector<64x128xf32> to vector<32x128xf32>
    %108 = math.tanh %107 : vector<32x128xf32>
    %109 = arith.mulf %106, %108 : vector<32x128xf32>
    %c0_47 = arith.constant 0 : index
    %c0_48 = arith.constant 0 : index
    %c0_49 = arith.constant 0 : index
    %110 = vector.load %arg11[%c0_47, %c0_48, %c0_49] : memref<4x64x32xbf16, #tpu.memory_space<vmem>>, vector<1x64x32xbf16>
    %111 = vector.shape_cast %110 : vector<1x64x32xbf16> to vector<64x32xbf16>
    %112 = arith.truncf %109 : vector<32x128xf32> to vector<32x128xbf16>
    %cst_50 = arith.constant dense<0.000000e+00> : vector<64x128xf32>
    %113 = tpu.matmul %111, %112, %cst_50 {dimension_numbers = #tpu.dot_dimension_numbers<[1], [0], [0], [1], [0, 0, 1, 1], [], []>} : vector<64x32xbf16>, vector<32x128xbf16>, vector<64x128xf32> -> vector<64x128xf32>
    %c0_51 = arith.constant 0 : index
    %c0_52 = arith.constant 0 : index
    %c0_53 = arith.constant 0 : index
    %114 = vector.load %arg12[%c0_51, %c0_52, %c0_53] : memref<4x64x1xf32, #tpu.memory_space<vmem>>, vector<1x64x1xf32>
    %115 = vector.shape_cast %114 : vector<1x64x1xf32> to vector<64x1xf32>
    %116 = vector.broadcast %115 : vector<64x1xf32> to vector<64x128xf32>
    %117 = arith.addf %113, %116 : vector<64x128xf32>
    %118 = arith.mulf %117, %36 : vector<64x128xf32>
    %119 = vector.extract_strided_slice %118 {offsets = [0, 0], sizes = [32, 128], strides = [1, 1]} : vector<64x128xf32> to vector<32x128xf32>
    %120 = arith.addf %73, %119 : vector<32x128xf32>
    %cst_54 = arith.constant 0.707106769 : f32
    %121 = vector.broadcast %cst_54 : f32 to vector<32x128xf32>
    %122 = arith.mulf %120, %121 : vector<32x128xf32>
    %123 = vector.extract_strided_slice %118 {offsets = [32, 0], sizes = [32, 128], strides = [1, 1]} : vector<64x128xf32> to vector<32x128xf32>
    %124 = arith.addf %76, %123 : vector<32x128xf32>
    %125 = vector.extract_strided_slice %75 {offsets = [0, 1], sizes = [32, 1], strides = [1, 1]} : vector<32x4xf32> to vector<32x1xf32>
    %126 = vector.broadcast %125 : vector<32x1xf32> to vector<32x128xf32>
    %127 = arith.addf %122, %126 : vector<32x128xf32>
    %128 = arith.truncf %127 : vector<32x128xf32> to vector<32x128xbf16>
    %c32_55 = arith.constant 32 : index
    %c0_56 = arith.constant 0 : index
    %129 = vector.load %arg22[%c32_55, %c0_56] : memref<128x128xbf16, #tpu.memory_space<vmem>>, vector<32x128xbf16>
    tpu.vector_store %arg22[%c32_55, %c0_56], %128 {strides = array<i32>} : memref<128x128xbf16, #tpu.memory_space<vmem>>, vector<32x128xbf16>,
    %c2_i32_57 = arith.constant 2 : i32
    %130 = tpu.dynamic_rotate %127 by %c2_i32_57 dim 1 : vector<32x128xf32>, i32 -> vector<32x128xf32>
    %131 = vector.broadcast %48 : vector<1x128xf32> to vector<32x128xf32>
    %132 = arith.mulf %130, %131 : vector<32x128xf32>
    %133 = arith.truncf %132 : vector<32x128xf32> to vector<32x128xbf16>
    %c0_58 = arith.constant 0 : index
    %c0_59 = arith.constant 0 : index
    %134 = vector.load %arg22[%c0_58, %c0_59] : memref<128x128xbf16, #tpu.memory_space<vmem>>, vector<32x128xbf16>
    tpu.vector_store %arg22[%c0_58, %c0_59], %133 {strides = array<i32>} : memref<128x128xbf16, #tpu.memory_space<vmem>>, vector<32x128xbf16>,
    %c126_i32 = arith.constant 126 : i32
    %135 = tpu.dynamic_rotate %127 by %c126_i32 dim 1 : vector<32x128xf32>, i32 -> vector<32x128xf32>
    %136 = vector.broadcast %56 : vector<1x128xf32> to vector<32x128xf32>
    %137 = arith.mulf %135, %136 : vector<32x128xf32>
    %138 = arith.truncf %137 : vector<32x128xf32> to vector<32x128xbf16>
    %c64_60 = arith.constant 64 : index
    %c0_61 = arith.constant 0 : index
    %139 = vector.load %arg22[%c64_60, %c0_61] : memref<128x128xbf16, #tpu.memory_space<vmem>>, vector<32x128xbf16>
    tpu.vector_store %arg22[%c64_60, %c0_61], %138 {strides = array<i32>} : memref<128x128xbf16, #tpu.memory_space<vmem>>, vector<32x128xbf16>,
    %c1 = arith.constant 1 : index
    %c0_62 = arith.constant 0 : index
    %c0_63 = arith.constant 0 : index
    %140 = vector.load %arg9[%c1, %c0_62, %c0_63] : memref<4x64x128xbf16, #tpu.memory_space<vmem>>, vector<1x64x128xbf16>
    %141 = vector.shape_cast %140 : vector<1x64x128xbf16> to vector<64x128xbf16>
    %c0_64 = arith.constant 0 : index
    %c0_65 = arith.constant 0 : index
    %142 = vector.load %arg22[%c0_64, %c0_65] : memref<128x128xbf16, #tpu.memory_space<vmem>>, vector<128x128xbf16>
    %cst_66 = arith.constant dense<0.000000e+00> : vector<64x128xf32>
    %143 = tpu.matmul %141, %142, %cst_66 {dimension_numbers = #tpu.dot_dimension_numbers<[1], [0], [0], [1], [0, 0, 1, 1], [], []>} : vector<64x128xbf16>, vector<128x128xbf16>, vector<64x128xf32> -> vector<64x128xf32>
    %c1_67 = arith.constant 1 : index
    %c0_68 = arith.constant 0 : index
    %c0_69 = arith.constant 0 : index
    %144 = vector.load %arg10[%c1_67, %c0_68, %c0_69] : memref<4x64x1xf32, #tpu.memory_space<vmem>>, vector<1x64x1xf32>
    %145 = vector.shape_cast %144 : vector<1x64x1xf32> to vector<64x1xf32>
    %146 = vector.broadcast %145 : vector<64x1xf32> to vector<64x128xf32>
    %147 = arith.addf %143, %146 : vector<64x128xf32>
    %148 = arith.mulf %147, %36 : vector<64x128xf32>
    %149 = vector.extract_strided_slice %148 {offsets = [0, 0], sizes = [32, 128], strides = [1, 1]} : vector<64x128xf32> to vector<32x128xf32>
    %150 = arith.negf %149 : vector<32x128xf32>
    %151 = math.exp %150 : vector<32x128xf32>
    %cst_70 = arith.constant 1.000000e+00 : f32
    %152 = vector.broadcast %cst_70 : f32 to vector<32x128xf32>
    %153 = arith.addf %152, %151 : vector<32x128xf32>
    %154 = arith.divf %152, %153 : vector<32x128xf32>
    %155 = vector.extract_strided_slice %148 {offsets = [32, 0], sizes = [32, 128], strides = [1, 1]} : vector<64x128xf32> to vector<32x128xf32>
    %156 = math.tanh %155 : vector<32x128xf32>
    %157 = arith.mulf %154, %156 : vector<32x128xf32>
    %c1_71 = arith.constant 1 : index
    %c0_72 = arith.constant 0 : index
    %c0_73 = arith.constant 0 : index
    %158 = vector.load %arg11[%c1_71, %c0_72, %c0_73] : memref<4x64x32xbf16, #tpu.memory_space<vmem>>, vector<1x64x32xbf16>
    %159 = vector.shape_cast %158 : vector<1x64x32xbf16> to vector<64x32xbf16>
    %160 = arith.truncf %157 : vector<32x128xf32> to vector<32x128xbf16>
    %cst_74 = arith.constant dense<0.000000e+00> : vector<64x128xf32>
    %161 = tpu.matmul %159, %160, %cst_74 {dimension_numbers = #tpu.dot_dimension_numbers<[1], [0], [0], [1], [0, 0, 1, 1], [], []>} : vector<64x32xbf16>, vector<32x128xbf16>, vector<64x128xf32> -> vector<64x128xf32>
    %c1_75 = arith.constant 1 : index
    %c0_76 = arith.constant 0 : index
    %c0_77 = arith.constant 0 : index
    %162 = vector.load %arg12[%c1_75, %c0_76, %c0_77] : memref<4x64x1xf32, #tpu.memory_space<vmem>>, vector<1x64x1xf32>
    %163 = vector.shape_cast %162 : vector<1x64x1xf32> to vector<64x1xf32>
    %164 = vector.broadcast %163 : vector<64x1xf32> to vector<64x128xf32>
    %165 = arith.addf %161, %164 : vector<64x128xf32>
    %166 = arith.mulf %165, %36 : vector<64x128xf32>
    %167 = vector.extract_strided_slice %166 {offsets = [0, 0], sizes = [32, 128], strides = [1, 1]} : vector<64x128xf32> to vector<32x128xf32>
    %168 = arith.addf %122, %167 : vector<32x128xf32>
    %cst_78 = arith.constant 0.707106769 : f32
    %169 = vector.broadcast %cst_78 : f32 to vector<32x128xf32>
    %170 = arith.mulf %168, %169 : vector<32x128xf32>
    %171 = vector.extract_strided_slice %166 {offsets = [32, 0], sizes = [32, 128], strides = [1, 1]} : vector<64x128xf32> to vector<32x128xf32>
    %172 = arith.addf %124, %171 : vector<32x128xf32>
    %173 = vector.extract_strided_slice %75 {offsets = [0, 2], sizes = [32, 1], strides = [1, 1]} : vector<32x4xf32> to vector<32x1xf32>
    %174 = vector.broadcast %173 : vector<32x1xf32> to vector<32x128xf32>
    %175 = arith.addf %170, %174 : vector<32x128xf32>
    %176 = arith.truncf %175 : vector<32x128xf32> to vector<32x128xbf16>
    %c32_79 = arith.constant 32 : index
    %c0_80 = arith.constant 0 : index
    %177 = vector.load %arg22[%c32_79, %c0_80] : memref<128x128xbf16, #tpu.memory_space<vmem>>, vector<32x128xbf16>
    tpu.vector_store %arg22[%c32_79, %c0_80], %176 {strides = array<i32>} : memref<128x128xbf16, #tpu.memory_space<vmem>>, vector<32x128xbf16>,
    %c1_i32_81 = arith.constant 1 : i32
    %178 = tpu.dynamic_rotate %175 by %c1_i32_81 dim 1 : vector<32x128xf32>, i32 -> vector<32x128xf32>
    %179 = vector.broadcast %44 : vector<1x128xf32> to vector<32x128xf32>
    %180 = arith.mulf %178, %179 : vector<32x128xf32>
    %181 = arith.truncf %180 : vector<32x128xf32> to vector<32x128xbf16>
    %c0_82 = arith.constant 0 : index
    %c0_83 = arith.constant 0 : index
    %182 = vector.load %arg22[%c0_82, %c0_83] : memref<128x128xbf16, #tpu.memory_space<vmem>>, vector<32x128xbf16>
    tpu.vector_store %arg22[%c0_82, %c0_83], %181 {strides = array<i32>} : memref<128x128xbf16, #tpu.memory_space<vmem>>, vector<32x128xbf16>,
    %c127_i32_84 = arith.constant 127 : i32
    %183 = tpu.dynamic_rotate %175 by %c127_i32_84 dim 1 : vector<32x128xf32>, i32 -> vector<32x128xf32>
    %184 = vector.broadcast %52 : vector<1x128xf32> to vector<32x128xf32>
    %185 = arith.mulf %183, %184 : vector<32x128xf32>
    %186 = arith.truncf %185 : vector<32x128xf32> to vector<32x128xbf16>
    %c64_85 = arith.constant 64 : index
    %c0_86 = arith.constant 0 : index
    %187 = vector.load %arg22[%c64_85, %c0_86] : memref<128x128xbf16, #tpu.memory_space<vmem>>, vector<32x128xbf16>
    tpu.vector_store %arg22[%c64_85, %c0_86], %186 {strides = array<i32>} : memref<128x128xbf16, #tpu.memory_space<vmem>>, vector<32x128xbf16>,
    %c2 = arith.constant 2 : index
    %c0_87 = arith.constant 0 : index
    %c0_88 = arith.constant 0 : index
    %188 = vector.load %arg9[%c2, %c0_87, %c0_88] : memref<4x64x128xbf16, #tpu.memory_space<vmem>>, vector<1x64x128xbf16>
    %189 = vector.shape_cast %188 : vector<1x64x128xbf16> to vector<64x128xbf16>
    %c0_89 = arith.constant 0 : index
    %c0_90 = arith.constant 0 : index
    %190 = vector.load %arg22[%c0_89, %c0_90] : memref<128x128xbf16, #tpu.memory_space<vmem>>, vector<128x128xbf16>
    %cst_91 = arith.constant dense<0.000000e+00> : vector<64x128xf32>
    %191 = tpu.matmul %189, %190, %cst_91 {dimension_numbers = #tpu.dot_dimension_numbers<[1], [0], [0], [1], [0, 0, 1, 1], [], []>} : vector<64x128xbf16>, vector<128x128xbf16>, vector<64x128xf32> -> vector<64x128xf32>
    %c2_92 = arith.constant 2 : index
    %c0_93 = arith.constant 0 : index
    %c0_94 = arith.constant 0 : index
    %192 = vector.load %arg10[%c2_92, %c0_93, %c0_94] : memref<4x64x1xf32, #tpu.memory_space<vmem>>, vector<1x64x1xf32>
    %193 = vector.shape_cast %192 : vector<1x64x1xf32> to vector<64x1xf32>
    %194 = vector.broadcast %193 : vector<64x1xf32> to vector<64x128xf32>
    %195 = arith.addf %191, %194 : vector<64x128xf32>
    %196 = arith.mulf %195, %36 : vector<64x128xf32>
    %197 = vector.extract_strided_slice %196 {offsets = [0, 0], sizes = [32, 128], strides = [1, 1]} : vector<64x128xf32> to vector<32x128xf32>
    %198 = arith.negf %197 : vector<32x128xf32>
    %199 = math.exp %198 : vector<32x128xf32>
    %cst_95 = arith.constant 1.000000e+00 : f32
    %200 = vector.broadcast %cst_95 : f32 to vector<32x128xf32>
    %201 = arith.addf %200, %199 : vector<32x128xf32>
    %202 = arith.divf %200, %201 : vector<32x128xf32>
    %203 = vector.extract_strided_slice %196 {offsets = [32, 0], sizes = [32, 128], strides = [1, 1]} : vector<64x128xf32> to vector<32x128xf32>
    %204 = math.tanh %203 : vector<32x128xf32>
    %205 = arith.mulf %202, %204 : vector<32x128xf32>
    %c2_96 = arith.constant 2 : index
    %c0_97 = arith.constant 0 : index
    %c0_98 = arith.constant 0 : index
    %206 = vector.load %arg11[%c2_96, %c0_97, %c0_98] : memref<4x64x32xbf16, #tpu.memory_space<vmem>>, vector<1x64x32xbf16>
    %207 = vector.shape_cast %206 : vector<1x64x32xbf16> to vector<64x32xbf16>
    %208 = arith.truncf %205 : vector<32x128xf32> to vector<32x128xbf16>
    %cst_99 = arith.constant dense<0.000000e+00> : vector<64x128xf32>
    %209 = tpu.matmul %207, %208, %cst_99 {dimension_numbers = #tpu.dot_dimension_numbers<[1], [0], [0], [1], [0, 0, 1, 1], [], []>} : vector<64x32xbf16>, vector<32x128xbf16>, vector<64x128xf32> -> vector<64x128xf32>
    %c2_100 = arith.constant 2 : index
    %c0_101 = arith.constant 0 : index
    %c0_102 = arith.constant 0 : index
    %210 = vector.load %arg12[%c2_100, %c0_101, %c0_102] : memref<4x64x1xf32, #tpu.memory_space<vmem>>, vector<1x64x1xf32>
    %211 = vector.shape_cast %210 : vector<1x64x1xf32> to vector<64x1xf32>
    %212 = vector.broadcast %211 : vector<64x1xf32> to vector<64x128xf32>
    %213 = arith.addf %209, %212 : vector<64x128xf32>
    %214 = arith.mulf %213, %36 : vector<64x128xf32>
    %215 = vector.extract_strided_slice %214 {offsets = [0, 0], sizes = [32, 128], strides = [1, 1]} : vector<64x128xf32> to vector<32x128xf32>
    %216 = arith.addf %170, %215 : vector<32x128xf32>
    %cst_103 = arith.constant 0.707106769 : f32
    %217 = vector.broadcast %cst_103 : f32 to vector<32x128xf32>
    %218 = arith.mulf %216, %217 : vector<32x128xf32>
    %219 = vector.extract_strided_slice %214 {offsets = [32, 0], sizes = [32, 128], strides = [1, 1]} : vector<64x128xf32> to vector<32x128xf32>
    %220 = arith.addf %172, %219 : vector<32x128xf32>
    %221 = vector.extract_strided_slice %75 {offsets = [0, 3], sizes = [32, 1], strides = [1, 1]} : vector<32x4xf32> to vector<32x1xf32>
    %222 = vector.broadcast %221 : vector<32x1xf32> to vector<32x128xf32>
    %223 = arith.addf %218, %222 : vector<32x128xf32>
    %224 = arith.truncf %223 : vector<32x128xf32> to vector<32x128xbf16>
    %c32_104 = arith.constant 32 : index
    %c0_105 = arith.constant 0 : index
    %225 = vector.load %arg22[%c32_104, %c0_105] : memref<128x128xbf16, #tpu.memory_space<vmem>>, vector<32x128xbf16>
    tpu.vector_store %arg22[%c32_104, %c0_105], %224 {strides = array<i32>} : memref<128x128xbf16, #tpu.memory_space<vmem>>, vector<32x128xbf16>,
    %c2_i32_106 = arith.constant 2 : i32
    %226 = tpu.dynamic_rotate %223 by %c2_i32_106 dim 1 : vector<32x128xf32>, i32 -> vector<32x128xf32>
    %227 = vector.broadcast %48 : vector<1x128xf32> to vector<32x128xf32>
    %228 = arith.mulf %226, %227 : vector<32x128xf32>
    %229 = arith.truncf %228 : vector<32x128xf32> to vector<32x128xbf16>
    %c0_107 = arith.constant 0 : index
    %c0_108 = arith.constant 0 : index
    %230 = vector.load %arg22[%c0_107, %c0_108] : memref<128x128xbf16, #tpu.memory_space<vmem>>, vector<32x128xbf16>
    tpu.vector_store %arg22[%c0_107, %c0_108], %229 {strides = array<i32>} : memref<128x128xbf16, #tpu.memory_space<vmem>>, vector<32x128xbf16>,
    %c126_i32_109 = arith.constant 126 : i32
    %231 = tpu.dynamic_rotate %223 by %c126_i32_109 dim 1 : vector<32x128xf32>, i32 -> vector<32x128xf32>
    %232 = vector.broadcast %56 : vector<1x128xf32> to vector<32x128xf32>
    %233 = arith.mulf %231, %232 : vector<32x128xf32>
    %234 = arith.truncf %233 : vector<32x128xf32> to vector<32x128xbf16>
    %c64_110 = arith.constant 64 : index
    %c0_111 = arith.constant 0 : index
    %235 = vector.load %arg22[%c64_110, %c0_111] : memref<128x128xbf16, #tpu.memory_space<vmem>>, vector<32x128xbf16>
    tpu.vector_store %arg22[%c64_110, %c0_111], %234 {strides = array<i32>} : memref<128x128xbf16, #tpu.memory_space<vmem>>, vector<32x128xbf16>,
    %c3 = arith.constant 3 : index
    %c0_112 = arith.constant 0 : index
    %c0_113 = arith.constant 0 : index
    %236 = vector.load %arg9[%c3, %c0_112, %c0_113] : memref<4x64x128xbf16, #tpu.memory_space<vmem>>, vector<1x64x128xbf16>
    %237 = vector.shape_cast %236 : vector<1x64x128xbf16> to vector<64x128xbf16>
    %c0_114 = arith.constant 0 : index
    %c0_115 = arith.constant 0 : index
    %238 = vector.load %arg22[%c0_114, %c0_115] : memref<128x128xbf16, #tpu.memory_space<vmem>>, vector<128x128xbf16>
    %cst_116 = arith.constant dense<0.000000e+00> : vector<64x128xf32>
    %239 = tpu.matmul %237, %238, %cst_116 {dimension_numbers = #tpu.dot_dimension_numbers<[1], [0], [0], [1], [0, 0, 1, 1], [], []>} : vector<64x128xbf16>, vector<128x128xbf16>, vector<64x128xf32> -> vector<64x128xf32>
    %c3_117 = arith.constant 3 : index
    %c0_118 = arith.constant 0 : index
    %c0_119 = arith.constant 0 : index
    %240 = vector.load %arg10[%c3_117, %c0_118, %c0_119] : memref<4x64x1xf32, #tpu.memory_space<vmem>>, vector<1x64x1xf32>
    %241 = vector.shape_cast %240 : vector<1x64x1xf32> to vector<64x1xf32>
    %242 = vector.broadcast %241 : vector<64x1xf32> to vector<64x128xf32>
    %243 = arith.addf %239, %242 : vector<64x128xf32>
    %244 = arith.mulf %243, %36 : vector<64x128xf32>
    %245 = vector.extract_strided_slice %244 {offsets = [0, 0], sizes = [32, 128], strides = [1, 1]} : vector<64x128xf32> to vector<32x128xf32>
    %246 = arith.negf %245 : vector<32x128xf32>
    %247 = math.exp %246 : vector<32x128xf32>
    %cst_120 = arith.constant 1.000000e+00 : f32
    %248 = vector.broadcast %cst_120 : f32 to vector<32x128xf32>
    %249 = arith.addf %248, %247 : vector<32x128xf32>
    %250 = arith.divf %248, %249 : vector<32x128xf32>
    %251 = vector.extract_strided_slice %244 {offsets = [32, 0], sizes = [32, 128], strides = [1, 1]} : vector<64x128xf32> to vector<32x128xf32>
    %252 = math.tanh %251 : vector<32x128xf32>
    %253 = arith.mulf %250, %252 : vector<32x128xf32>
    %c3_121 = arith.constant 3 : index
    %c0_122 = arith.constant 0 : index
    %c0_123 = arith.constant 0 : index
    %254 = vector.load %arg11[%c3_121, %c0_122, %c0_123] : memref<4x64x32xbf16, #tpu.memory_space<vmem>>, vector<1x64x32xbf16>
    %255 = vector.shape_cast %254 : vector<1x64x32xbf16> to vector<64x32xbf16>
    %256 = arith.truncf %253 : vector<32x128xf32> to vector<32x128xbf16>
    %cst_124 = arith.constant dense<0.000000e+00> : vector<64x128xf32>
    %257 = tpu.matmul %255, %256, %cst_124 {dimension_numbers = #tpu.dot_dimension_numbers<[1], [0], [0], [1], [0, 0, 1, 1], [], []>} : vector<64x32xbf16>, vector<32x128xbf16>, vector<64x128xf32> -> vector<64x128xf32>
    %c3_125 = arith.constant 3 : index
    %c0_126 = arith.constant 0 : index
    %c0_127 = arith.constant 0 : index
    %258 = vector.load %arg12[%c3_125, %c0_126, %c0_127] : memref<4x64x1xf32, #tpu.memory_space<vmem>>, vector<1x64x1xf32>
    %259 = vector.shape_cast %258 : vector<1x64x1xf32> to vector<64x1xf32>
    %260 = vector.broadcast %259 : vector<64x1xf32> to vector<64x128xf32>
    %261 = arith.addf %257, %260 : vector<64x128xf32>
    %262 = arith.mulf %261, %36 : vector<64x128xf32>
    %263 = vector.extract_strided_slice %262 {offsets = [32, 0], sizes = [32, 128], strides = [1, 1]} : vector<64x128xf32> to vector<32x128xf32>
    %264 = arith.addf %220, %263 : vector<32x128xf32>
    %cst_128 = arith.constant 5.000000e-01 : f32
    %265 = vector.broadcast %cst_128 : f32 to vector<32x128xf32>
    %266 = arith.mulf %264, %265 : vector<32x128xf32>
    %c0_129 = arith.constant 0 : index
    %c0_130 = arith.constant 0 : index
    %267 = vector.load %arg13[%c0_129, %c0_130] : memref<32x32xbf16, #tpu.memory_space<vmem>>, vector<32x32xbf16>
    %268 = arith.truncf %266 : vector<32x128xf32> to vector<32x128xbf16>
    %cst_131 = arith.constant dense<0.000000e+00> : vector<32x128xf32>
    %269 = tpu.matmul %267, %268, %cst_131 {dimension_numbers = #tpu.dot_dimension_numbers<[1], [0], [0], [1], [0, 0, 1, 1], [], []>} : vector<32x32xbf16>, vector<32x128xbf16>, vector<32x128xf32> -> vector<32x128xf32>
    %c0_132 = arith.constant 0 : index
    %c0_133 = arith.constant 0 : index
    %270 = vector.load %arg14[%c0_132, %c0_133] : memref<32x1xf32, #tpu.memory_space<vmem>>, vector<32x1xf32>
    %271 = vector.broadcast %270 : vector<32x1xf32> to vector<32x128xf32>
    %272 = arith.addf %269, %271 : vector<32x128xf32>
    %273 = vector.broadcast %34 : vector<1x128xf32> to vector<32x128xf32>
    %274 = arith.mulf %272, %273 : vector<32x128xf32>
    %cst_134 = arith.constant 0.000000e+00 : f32
    %275 = vector.broadcast %cst_134 : f32 to vector<32x128xf32>
    %276 = arith.maximumf %274, %275 : vector<32x128xf32>
    %c0_135 = arith.constant 0 : index
    %c0_136 = arith.constant 0 : index
    %277 = vector.load %arg15[%c0_135, %c0_136] : memref<8x32xbf16, #tpu.memory_space<vmem>>, vector<8x32xbf16>
    %278 = arith.truncf %276 : vector<32x128xf32> to vector<32x128xbf16>
    %cst_137 = arith.constant dense<0.000000e+00> : vector<8x128xf32>
    %279 = tpu.matmul %277, %278, %cst_137 {dimension_numbers = #tpu.dot_dimension_numbers<[1], [0], [0], [1], [0, 0, 1, 1], [], []>} : vector<8x32xbf16>, vector<32x128xbf16>, vector<8x128xf32> -> vector<8x128xf32>
    %c0_138 = arith.constant 0 : index
    %c0_139 = arith.constant 0 : index
    %280 = vector.load %arg16[%c0_138, %c0_139] : memref<8x1xf32, #tpu.memory_space<vmem>>, vector<8x1xf32>
    %281 = vector.broadcast %280 : vector<8x1xf32> to vector<8x128xf32>
    %282 = arith.addf %279, %281 : vector<8x128xf32>
    %283 = vector.broadcast %34 : vector<1x128xf32> to vector<8x128xf32>
    %284 = arith.mulf %282, %283 : vector<8x128xf32>
    %c0_140 = arith.constant 0 : index
    %c0_141 = arith.constant 0 : index
    %c0_142 = arith.constant 0 : index
    %285 = vector.load %arg17[%c0_140, %c0_141, %c0_142] : memref<1x8x128xf32, #tpu.memory_space<vmem>>, vector<1x8x128xf32>
    %286 = vector.shape_cast %285 : vector<1x8x128xf32> to vector<8x128xf32>
    %287 = vector.shape_cast %284 : vector<8x128xf32> to vector<1x8x128xf32>
    tpu.vector_store %arg17[%c0_140, %c0_141, %c0_142], %287 {strides = array<i32>} : memref<1x8x128xf32, #tpu.memory_space<vmem>>, vector<1x8x128xf32>,
    return
  }
  func.func @transform_0(%arg0: i32, %arg1: i32) -> (i32, i32, i32) {
    %c0_i32 = arith.constant 0 : i32
    %c0_i32_0 = arith.constant 0 : i32
    %c0_i32_1 = arith.constant 0 : i32
    return %arg0, %c0_i32, %c0_i32_0 : i32, i32, i32
  }
  func.func @transform_5(%arg0: i32, %arg1: i32) -> (i32, i32) {
    %c0_i32 = arith.constant 0 : i32
    %c0_i32_0 = arith.constant 0 : i32
    %c0_i32_1 = arith.constant 0 : i32
    return %c0_i32, %c0_i32_0 : i32, i32
  }
  func.func @transform_6(%arg0: i32, %arg1: i32) -> (i32, i32) {
    %c0_i32 = arith.constant 0 : i32
    %c0_i32_0 = arith.constant 0 : i32
    %c0_i32_1 = arith.constant 0 : i32
    return %c0_i32, %c0_i32_0 : i32, i32
  }
  func.func @transform_7(%arg0: i32, %arg1: i32) -> (i32, i32, i32) {
    %c0_i32 = arith.constant 0 : i32
    %c0_i32_0 = arith.constant 0 : i32
    %c0_i32_1 = arith.constant 0 : i32
    %c0_i32_2 = arith.constant 0 : i32
    return %c0_i32, %c0_i32_0, %c0_i32_1 : i32, i32, i32
  }
  func.func @transform_8(%arg0: i32, %arg1: i32) -> (i32, i32, i32) {
    %c0_i32 = arith.constant 0 : i32
    %c0_i32_0 = arith.constant 0 : i32
    %c0_i32_1 = arith.constant 0 : i32
    %c0_i32_2 = arith.constant 0 : i32
    return %c0_i32, %c0_i32_0, %c0_i32_1 : i32, i32, i32
  }
  func.func @transform_9(%arg0: i32, %arg1: i32) -> (i32, i32, i32) {
    %c0_i32 = arith.constant 0 : i32
    %c0_i32_0 = arith.constant 0 : i32
    %c0_i32_1 = arith.constant 0 : i32
    %c0_i32_2 = arith.constant 0 : i32
    return %c0_i32, %c0_i32_0, %c0_i32_1 : i32, i32, i32
  }
  func.func @transform_10(%arg0: i32, %arg1: i32) -> (i32, i32, i32) {
    %c0_i32 = arith.constant 0 : i32
    %c0_i32_0 = arith.constant 0 : i32
    %c0_i32_1 = arith.constant 0 : i32
    %c0_i32_2 = arith.constant 0 : i32
    return %c0_i32, %c0_i32_0, %c0_i32_1 : i32, i32, i32
  }
  func.func @transform_11(%arg0: i32, %arg1: i32) -> (i32, i32) {
    %c0_i32 = arith.constant 0 : i32
    %c0_i32_0 = arith.constant 0 : i32
    %c0_i32_1 = arith.constant 0 : i32
    return %c0_i32, %c0_i32_0 : i32, i32
  }
  func.func @transform_12(%arg0: i32, %arg1: i32) -> (i32, i32) {
    %c0_i32 = arith.constant 0 : i32
    %c0_i32_0 = arith.constant 0 : i32
    %c0_i32_1 = arith.constant 0 : i32
    return %c0_i32, %c0_i32_0 : i32, i32
  }
  func.func @transform_13(%arg0: i32, %arg1: i32) -> (i32, i32) {
    %c0_i32 = arith.constant 0 : i32
    %c0_i32_0 = arith.constant 0 : i32
    %c0_i32_1 = arith.constant 0 : i32
    return %c0_i32, %c0_i32_0 : i32, i32
  }
  func.func @transform_14(%arg0: i32, %arg1: i32) -> (i32, i32) {
    %c0_i32 = arith.constant 0 : i32
    %c0_i32_0 = arith.constant 0 : i32
    %c0_i32_1 = arith.constant 0 : i32
    return %c0_i32, %c0_i32_0 : i32, i32
  }
  func.func @transform_15(%arg0: i32, %arg1: i32) -> (i32, i32, i32) {
    %c0_i32 = arith.constant 0 : i32
    %c0_i32_0 = arith.constant 0 : i32
    return %arg0, %c0_i32, %arg1 : i32, i32, i32
  }
}

</mosaic_0001>

<bundles_post_ra>
// kernel: tpu_custom_call.1
= control target key start
LH: loop header
LB: loop body
LE: loop exit
PB: predicated region body
PF: predicated region fallthrough
CT: control target
= control target key end

     0   :  { %s5165_s0 = inlined_call_operand.vmem [shape: f32[2,32,4], index: 0, kind: input, shape index: {}]   ;;  %s5166_s1 = inlined_call_operand.vmem [shape: bf16[2,8,128], index: 1, kind: input, shape index: {}]   ;;  %s5167_s2 = inlined_call_operand.vmem [shape: bf16[2,32,128], index: 2, kind: input, shape index: {}]   ;;  %s5168_s3 = inlined_call_operand.vmem [shape: bf16[2,32,128], index: 3, kind: input, shape index: {}]   ;;  %s5169_s4 = inlined_call_operand.vmem [shape: f32[2,1,128], index: 4, kind: input, shape index: {}]   ;;  %s5170_s5 = inlined_call_operand.vmem [shape: bf16[32,8], index: 5, kind: input, shape index: {}]   ;;  %s5171_s6 = inlined_call_operand.vmem [shape: f32[32,1], index: 6, kind: input, shape index: {}]   ;;  %s5172_s7 = inlined_call_operand.vmem [shape: bf16[4,64,128], index: 7, kind: input, shape index: {}]   ;;  %s5173_s8 = inlined_call_operand.vmem [shape: f32[4,64,1], index: 8, kind: input, shape index: {}]   ;;  %s5174_s9 = inlined_call_operand.vmem [shape: bf16[4,64,32], index: 9, kind: input, shape index: {}]   ;;  %s5175_s10 = inlined_call_operand.vmem [shape: f32[4,64,1], index: 10, kind: input, shape index: {}]   ;;  %s5176_s11 = inlined_call_operand.vmem [shape: bf16[32,32], index: 11, kind: input, shape index: {}]   ;;  %s5177_s12 = inlined_call_operand.vmem [shape: f32[32,1], index: 12, kind: input, shape index: {}]   ;;  %s5178_s13 = inlined_call_operand.vmem [shape: bf16[8,32], index: 13, kind: input, shape index: {}]   ;;  %s5179_s14 = inlined_call_operand.vmem [shape: f32[8,1], index: 14, kind: input, shape index: {}]   ;;  %s5180_s15 = inlined_call_operand.hbm [shape: f32[2,8,128], index: 15, kind: output, shape index: {}]  }
   0x1   :  { %5194 = sst [smem:[#allocation27_spill]] %s5178_s13 }
   0x2   :  { %5195 = sst [smem:[#allocation28_spill]] %s5180_s15 }
   0x3   :  { %20 = vsyncpa [#allocation9], 0 }
   0x4   :  { %22 = vsyncpa [#allocation9 + $0x1], 0  ;;  %s4395_s18 = smov 0   ;;  %s4397_s19 = smov 0  }
   0x5   :  { %s4399_s20 = smov 0   ;;  %s4401_s21 = smov 0  }
   0x6   :  { %s4403_s22 = smov 0   ;;  %s4405_s23 = smov 0  }
   0x7 LB: > { %5196 = sst [smem:[#allocation19_spill]] %s4282_s18  ;;  %s3218_s24 = sadd.s32 4294967295, %s4302_s23   ;;  %s4302_s23 = sphi %s4405_s23, %s28_s23   ;;  %s4298_s22 = sphi %s4403_s22, %s5219_s22   ;;  %s4294_s21 = sphi %s4401_s21, %s5218_s21   ;;  %s4290_s20 = sphi %s4399_s20, %s5217_s20   ;;  %s4286_s19 = sphi %s4397_s19, %s5221_s19   ;;  %s4282_s18 = sphi %s4395_s18, %s5220_s18  }
   0x8   : > { %5197 = sst [smem:[#allocation20_spill]] %s4290_s20  ;;  %s3219_s25 = sadd.s32 4294967294, %s4302_s23  }
   0x9   : > { %5198 = sst [smem:[#allocation21_spill]] %s4298_s22  ;;  %s40_s26 = sadd.s32 1, %s4298_s22 }
   0xa   : > { %5199 = sst [smem:[#allocation22_spill]] %s4302_s23  ;;  %s285_s27 = sadd.s32 1, %s4290_s20 }
   0xb   : > { %p42_p0 = scmp.ge.s32.totalorder %s40_s26, 2  ;;  %p295_p1 = scmp.ne.s32.totalorder %s4290_s20, %s4286_s19 }
   0xc   : > { %p296_p2 = scmp.eq.s32.totalorder %s3218_s24, 1  ;;  %p301_p3 = scmp.ne.s32.totalorder %s4286_s19, %s4282_s18 }
   0xd   : > { %s5223_s26 = smov (%p42_p0, %s40_s26), 0  ;;  %p302_p5 = scmp.eq.s32.totalorder %s3219_s25, 1 }
   0xe   : > { %5200 = sst [smem:[#allocation23_spill]] %s5223_s26  ;;  %p4435_p4 = por %p296_p2, %p295_p1 }
   0xf   : > { %s280_s29 = ssub.s32 %s4298_s22, %s5223_s26  ;;  %p3222_p6 = scmp.ge.s32.totalorder %s4302_s23, 1 }
  0x10   : > { %s5201_s28 = scalar_select %p4435_p4, 1, 0 }
  0x11   : > { %p283_p7 = scmp.eq.s32.totalorder %s280_s29, 0  ;;  %p4442_p8 = por %p302_p5, %p301_p3 }
  0x12   : > { %5202 = sst [smem:[#allocation24_spill]] %s5201_s28  ;;  %p358_p9 = scmp.lt.s32.totalorder %s4302_s23, 3 }
  0x13   : > { %s5203_s30 = scalar_select %p4442_p8, 1, 0 }
  0x14   : > { %s4448_s16 = scalar_select %p283_p7, %s4290_s20, %s285_s27  }
  0x15   : > { %5204 = sst [smem:[#allocation25_spill]] %s5203_s30  ;;  %p359_p10 = pnand %p3222_p6, %p358_p9 }
  0x16   : > { %5205 = sst [smem:[#allocation26_spill]] %s4448_s16  ;;  %s5188_s17 = sand.u32 (!%p359_p10), 1, %s4286_s19  }
  0x17   : > { %362 = sbr.rel (%p359_p10) target bundleno = 3110 (0xc26), region = 64  ;;  %p398_p11 = scmp.lt.s32.totalorder (!%p359_p10), %s4294_s21, 1 }
  0x18   : > { %s4454_s24 = sshll.u32 (!%p359_p10), %s5188_s17, 3  ;;  %s3226_s25 = sshll.u32 (!%p359_p10), %s4294_s21, 2 }
  0x19   : > { %s409_s22 = scalar_lea.vmem (!%p359_p10), %s5166_s1, %s3226_s25 }
  0x1c   : > { %s399_s27 = scalar_select %p398_p11, %s4294_s21, 1  ;;  %v428_v0 = vld [vmem:[%s409_s22] sm:$0xf] }
  0x1d   : > { %429 = vst [vmem:[#allocation2] sm:$0xf] %v428_v0 }
  0x1e   : > { %s3496_s16 = sshll.u32 %s399_s27, 5 }
  0x1f   : > { %s4464_s18 = scalar_lea.vmem %s5165_s0, %s3496_s16 }
  0x20   : > { %455 = vsyncadd [#allocation7], 64  ;;  %s3497_s17 = sshll.u32 %s4294_s21, 4 }
  0x21   : > { %s459_s13 = scalar_lea.vmem %s5167_s2, %s3497_s17 }
  0x22   : > { %v4471_v1 = vld [vmem:[%s459_s13] sm:$0xff]  ;;  %v496_v2 = vld [vmem:[%s459_s13 + $0x8] sm:$0xff] }
  0x23   : > { %505 = vsyncadd [#allocation7 + $0x1], 256  ;;  %s507_s25 = scalar_lea.vmem %s5168_s3, %s3497_s17 }
  0x24   : > { %v542_v3 = vld [vmem:[%s507_s25] sm:$0xff]  ;;  %v544_v4 = vld [vmem:[%s507_s25 + $0x8] sm:$0xff] }
  0x25   : > { %553 = vsyncadd [#allocation7 + $0x2], 256  ;;  %s554_s16 = scalar_lea.vmem %s5169_s4, %s4294_s21 }
  0x26   : > { %v574_v5 = vld [vmem:[%s554_s16] sm:$0x1] }
  0x27   : > { %575 = vst [vmem:[#allocation5] sm:$0x1] %v574_v5 }
  0x28   : > { %601 = vsyncadd [#allocation7 + $0x3], 16 }
  0x29   : > { %4268 = dma.done.wait [#allocation7], 64 }
  0x2a   : > { %4269 = vsyncadd [#allocation7], 4294967232 }
  0x2b   : > { %4270 = dma.done.wait [#allocation7 + $0x1], 256 }
  0x2c   : > { %4271 = vsyncadd [#allocation7 + $0x1], 4294967040 }
  0x2d   : > { %4272 = dma.done.wait [#allocation7 + $0x2], 256 }
  0x2e   : > { %4273 = vsyncadd [#allocation7 + $0x2], 4294967040 }
  0x2f   : > { %4274 = dma.done.wait [#allocation7 + $0x3], 16 }
  0x30   : > { %4275 = vsyncadd [#allocation7 + $0x3], 4294967280  ;;  %v4304_v6 = vmov 0   ;;  %vm724_vm0 = vcmask 1043456   ;;  %vm717_vm1 = vcmask 64512   ;;  %v4049_v9 = vld [vmem:[%s5170_s5] sm:$0xff]   ;;  %v3557_v19 = vunpack.c.l.bf16 %v496_v2 }
  0x31   : > { %4035 = vset.pattern.permute.xlu0 %v4304_v6  ;;  %4036 = vset.pattern.permute.xlu1 %v4304_v6  ;;  %v682_v7 = vld [vmem:[#allocation2] sm:$0xf]  ;;  %v4050_v10 = vld [vmem:[%s5170_s5 + $0x8] sm:$0xff]   ;;  %v685_v11 = vld [vmem:[%s5171_s6 + $0x10] sm:$0xff]  ;;  %v3558_v20 = vunpack.c.h.bf16 %v496_v2  ;;  %v3565_v21 = vunpack.c.l.bf16 %v544_v4  ;;  %v3566_v22 = vunpack.c.h.bf16 %v544_v4  ;;  %v3553_v28 = vunpack.c.l.bf16 %v4471_v1  ;;  %s4305_s13 = smov 127   ;;  %s4306_s15 = smov 1  }
  0x32   : > { %3969 = vmatprep.subr.msk.bf16.mxu0 %vm724_vm0, %v682_v7  ;;  %v726_v8 = vsel %vm724_vm0, %v682_v7, 0  ;;  %v683_v12 = vld [vmem:[%s5171_s6] sm:$0xff]  ;;  %3805 = vmatprep.mubr.msk.bf16.mxu0 %vm717_vm1, %v4049_v9  ;;  %v686_v13 = vld [vmem:[%s5171_s6 + $0x18] sm:$0xff]  ;;  %v684_v14 = vld [vmem:[%s5171_s6 + $0x8] sm:$0xff]  ;;  %v3554_v29 = vunpack.c.h.bf16 %v4471_v1  ;;  %v3561_v30 = vunpack.c.l.bf16 %v542_v3  ;;  %v3562_v31 = vunpack.c.h.bf16 %v542_v3  ;;  %s4309_s25 = smov 126   ;;  %s5192_s20 = smov 2  }
  0x33   : > { %3804 = vmatpush3.bf16.msra.mxu0 %v726_v8  ;;  %699 = vperm.xlu0 %4035, %v685_v11   ;;  %v4501_v15 = vld [vmem:[%s4464_s18 + $0x10] sm:$0xff]  ;;  %v4504_v16 = vld [vmem:[%s4464_s18 + $0x18] sm:$0xff]  ;;  %v4507_v17 = vld [vmem:[%s4464_s18] sm:$0xff]  ;;  %v656_v24 = vadd.f32 %v3565_v21, %v3557_v19  ;;  %v657_v25 = vadd.f32 %v3566_v22, %v3558_v20  ;;  %v622_v20 = vlaneseq  ;;  %vm1224_vm4 = vcmask 261120   ;;  %s5206_s22 = smov 2   ;;  %s5207_s29 = sld [smem:[#allocation27_spill]] }
  0x34   : > { %689 = vperm.xlu1 %4036, %v683_v12   ;;  %v4511_v18 = vld [vmem:[%s4464_s18 + $0x8] sm:$0xff]  ;;  %v654_v32 = vadd.f32 %v3561_v30, %v3553_v28  ;;  %v655_v33 = vadd.f32 %v3562_v31, %v3554_v29  ;;  %v4518_v37 = vld [vmem:[#allocation5] ss:$0 sm:$0xff]  ;;  %v923_v2 = vld [vmem:[%s5173_s8 + $0x10] sm:$0xff]  ;;  %vm4313_vm7 = vmmov 0   ;;  %s3489_s27 = sshll.u32 %s4294_s21, 7 }
  0x35   : > { %v3575_v27 = vpack.c.bf16 %v657_v25, %v656_v24  ;;  %v924_v3 = vld [vmem:[%s5173_s8 + $0x18] sm:$0xff]  ;;  %v921_v4 = vld [vmem:[%s5173_s8] sm:$0xff]  ;;  %v922_v5 = vld [vmem:[%s5173_s8 + $0x8] sm:$0xff]  ;;  %v4591_v21 = vand.u32 127, %v622_v20  ;;  %s5210_s16 = sld [smem:[#allocation28_spill]]  ;;  %s5212_s21 = sand.u32 1, %s4286_s19  }
  0x36   : > { %3806 = vmatmul.mubr.msk.bf16.vlgmr.msra.gmra.mxu0 %vm717_vm1, %v4050_v10  ;;  %v3570_v35 = vpack.c.bf16 %v655_v33, %v654_v32  ;;  %v927_v7 = vld [vmem:[%s5173_s8 + $0x30] sm:$0xff]  ;;  %v928_v8 = vld [vmem:[%s5173_s8 + $0x38] sm:$0xff]  ;;  %v925_v9 = vld [vmem:[%s5173_s8 + $0x20] sm:$0xff]  ;;  %s4314_s23 = smov [#allocation8]  }
  0x37   : > { %704 = vperm.xlu0 %4035, %v686_v13   ;;  %3700 = vst [vmem:[#allocation6 + $0x38] sm:$0xff] %v3575_v27   ;;  %v4059_v10 = vld [vmem:[%s5172_s7] sm:$0xff]   ;;  %v926_v11 = vld [vmem:[%s5173_s8 + $0x28] sm:$0xff]  ;;  %v1158_v12 = vld [vmem:[%s5175_s10 + $0x10] sm:$0xff]  ;;  %vm632_vm2 = vcmp.lt.s32.totalorder %v4591_v21, 15  ;;  %vm626_vm3 = vcmp.ge.s32.totalorder %v4591_v21, 1 }
  0x38   : > { %694 = vperm.xlu1 %4036, %v684_v14   ;;  %3699 = vst [vmem:[#allocation6 + $0x30] sm:$0xff] %v3570_v35   ;;  %3825 = vmatprep.mubr.bf16.mxu1 %v4059_v10  ;;  %v1159_v13 = vld [vmem:[%s5175_s10 + $0x18] sm:$0xff]  ;;  %v1156_v14 = vld [vmem:[%s5175_s10] sm:$0xff]  ;;  %v1157_v19 = vld [vmem:[%s5175_s10 + $0x8] sm:$0xff]  ;;  %vm635_vm5 = vcmp.lt.s32.totalorder %v4591_v21, 14  ;;  %vm629_vm6 = vcmp.ge.s32.totalorder %v4591_v21, 2 }
  0x3b   : > { %801 = vperm.xlu0 %4035, %v4501_v15   ;;  %s5115_s28 = scalar_lea.hbm %s5210_s16, %s3489_s27 }
  0x3c   : > { %806 = vperm.xlu1 %4036, %v4504_v16  }
  0x3e   : > { %v4051_v43 = vld [vmem:[#allocation6 + $0x38] sm:$0xff]  }
  0x3f   : > { %791 = vperm.xlu0 %4035, %v4507_v17   ;;  %3809 = vmatprep.subr.bf16.mxu1 %v4051_v43  ;;  %v4052_v55 = vld [vmem:[#allocation6 + $0x30] sm:$0xff]  }
  0x40   : > { %796 = vperm.xlu1 %4036, %v4511_v18   ;;  %3810 = vmatpush3.bf16.msra.mxu1 %v4051_v43 }
  0x41   : > { %3811 = vmatprep.subr.bf16.mxu1 %v4052_v55 }
  0x44   : > { %3812 = vmatpush3.bf16.msra.mxu1 %v4052_v55 }
  0xae   : > { %v700_v23 = vpop.permute.xlu0 %699 }
  0xaf   : > { %v690_v26 = vpop.permute.xlu1 %689 }
  0xb2   : > { %v705_v34 = vpop.permute.xlu0 %704 }
  0xb3   : > { %v695_v36 = vpop.permute.xlu1 %694 }
  0xb6   : > { %v802_v44 = vpop.permute.xlu0 %801 }
  0xb7   : > { %v807_v49 = vpop.permute.xlu1 %806 }
  0xba   : > { %v792_v58 = vpop.permute.xlu0 %791 }
  0xbb   : > { %v797_v62 = vpop.permute.xlu1 %796 }
  0xf6   : > { %v3807_v38 = vpop.f32.mrf.mxu0 }
  0xf7   : > { %v771_v39 = vadd.f32 %v3807_v38, %v700_v23  ;;  %v4307_v23 = vmov 0.0  }
  0xf8   : > { %v762_v40 = vpop.f32.mrf.mxu0  ;;  %v4595_v24 = vsel %vm632_vm2, 1.0, %v4307_v23 }
  0xf9   : > { %v4521_v41 = vmul.f32 %v4518_v37, %v771_v39  ;;  %v763_v42 = vadd.f32 %v762_v40, %v690_v26 }
  0xfa   : > { %v3808_v45 = vpop.f32.mrf.mxu0 }
  0xfb   : > { %v783_v46 = vmax.f32 %v4521_v41, 0.0  ;;  %v4525_v47 = vmul.f32 %v4518_v37, %v763_v42  ;;  %v774_v48 = vadd.f32 %v3808_v45, %v705_v34  ;;  %v4603_v34 = vsel %vm626_vm3, 1.0, %v4307_v23 }
  0xfc   : > { %v765_v50 = vpop.f32.mrf.mxu0 }
  0xfd   : > { %v781_v51 = vmax.f32 %v4525_v47, 0.0  ;;  %v4529_v52 = vmul.f32 %v4518_v37, %v774_v48  ;;  %v766_v53 = vadd.f32 %v765_v50, %v695_v36  ;;  %v811_v54 = vadd.f32 %v802_v44, %v783_v46 }
  0xff   : > { %v784_v56 = vmax.f32 %v4529_v52, 0.0  ;;  %v4535_v57 = vmul.f32 %v4518_v37, %v766_v53  ;;  %869 = vrot.lane.b32.xlu0 %v811_v54, %s4305_s13  ;;  %v809_v61 = vadd.f32 %v792_v58, %v781_v51 }
 0x101   : > { %v782_v59 = vmax.f32 %v4535_v57, 0.0  ;;  %v812_v60 = vadd.f32 %v807_v49, %v784_v56  ;;  %v4070_v57 = vld [vmem:[%s5174_s9 + $0x10] sm:$0xff]  }
 0x103   : > { %871 = vrot.lane.b32.xlu1 %v812_v60, %s4305_s13  ;;  %v3585_v63 = vpack.c.bf16 %v812_v60, %v811_v54  ;;  %865 = vrot.lane.b32.xlu0 %v809_v61, %s4305_s13  ;;  %v810_v0 = vadd.f32 %v797_v62, %v782_v59  ;;  %v4062_v62 = vld [vmem:[%s5172_s7 + $0x18] sm:$0xff]  }
 0x105   : > { %3702 = vst [vmem:[#allocation6 + $0x18] sm:$0xff] %v3585_v63   ;;  %v3580_v1 = vpack.c.bf16 %v810_v0, %v809_v61  ;;  %v4063_v63 = vld [vmem:[%s5174_s9] sm:$0xff]  }
 0x106   : > { %3837 = vmatprep.mubr.msk.bf16.mxu0 %vm1224_vm4, %v4063_v63 }
 0x107   : > { %867 = vrot.lane.b32.xlu1 %v810_v0, %s4305_s13  ;;  %3701 = vst [vmem:[#allocation6 + $0x10] sm:$0xff] %v3580_v1   ;;  %837 = vrot.lane.b32.xlu0 %v811_v54, %s4306_s15 }
 0x10b   : > { %839 = vrot.lane.b32.xlu1 %v812_v60, %s4306_s15  ;;  %833 = vrot.lane.b32.xlu0 %v809_v61, %s4306_s15  ;;  %v4060_v60 = vld [vmem:[%s5172_s7 + $0x8] sm:$0xff]   ;;  %v4061_v61 = vld [vmem:[%s5172_s7 + $0x10] sm:$0xff]  }
 0x10c   : > { %v4055_v53 = vld [vmem:[#allocation6 + $0x18] sm:$0xff]  }
 0x10e   : > { %v4056_v54 = vld [vmem:[#allocation6 + $0x10] sm:$0xff]  }
 0x10f   : > { %835 = vrot.lane.b32.xlu1 %v810_v0, %s4306_s15  ;;  %941 = vperm.xlu0 %4035, %v923_v2   ;;  %v4308_v0 = vmov 1  }
 0x113   : > { %946 = vperm.xlu1 %4036, %v924_v3   ;;  %931 = vperm.xlu0 %4035, %v921_v4  }
 0x117   : > { %936 = vperm.xlu1 %4036, %v922_v5   ;;  %961 = vperm.xlu0 %4035, %v927_v7  }
 0x11b   : > { %966 = vperm.xlu1 %4036, %v928_v8   ;;  %951 = vperm.xlu0 %4035, %v925_v9  }
 0x11f   : > { %956 = vperm.xlu1 %4036, %v926_v11   ;;  %1176 = vperm.xlu0 %4035, %v1158_v12  }
 0x123   : > { %1181 = vperm.xlu1 %4036, %v1159_v13   ;;  %1166 = vperm.xlu0 %4035, %v1156_v14  }
 0x127   : > { %1171 = vperm.xlu1 %4036, %v1157_v19   ;;  %4037 = vset.pattern.permute.xlu0 %v4308_v0 }
 0x128   : > { %1331 = vperm.xlu0 %4037, %v4501_v15  }
 0x12b   : > { %4038 = vset.pattern.permute.xlu1 %v4308_v0 }
 0x12c   : > { %1335 = vperm.xlu1 %4038, %v4504_v16   ;;  %1327 = vperm.xlu0 %4037, %v4511_v18  }
 0x130   : > { %1323 = vperm.xlu1 %4038, %v4507_v17   ;;  %4040 = vset.pattern.permute.xlu0 %v4304_v6 }
 0x134   : > { %4039 = vset.pattern.permute.xlu1 %v4304_v6 }
 0x171   : > { %v870_v22 = vpop.permute.xlu0 %869 }
 0x172   : > { %v875_v27 = vmul.f32 %v4595_v24, %v870_v22 }
 0x175   : > { %v872_v25 = vpop.permute.xlu1 %871  ;;  %v866_v26 = vpop.permute.xlu0 %865 }
 0x176   : > { %v876_v28 = vmul.f32 %v4595_v24, %v872_v25  ;;  %v873_v32 = vmul.f32 %v4595_v24, %v866_v26 }
 0x178   : > { %v3605_v29 = vpack.c.bf16 %v876_v28, %v875_v27 }
 0x179   : > { %v868_v30 = vpop.permute.xlu1 %867  ;;  %v838_v31 = vpop.permute.xlu0 %837 }
 0x17a   : > { %3705 = vst [vmem:[#allocation6 + $0x28] sm:$0xff] %v3605_v29   ;;  %v874_v33 = vmul.f32 %v4595_v24, %v868_v30  ;;  %v843_v38 = vmul.f32 %v4603_v34, %v838_v31 }
 0x17c   : > { %v3600_v35 = vpack.c.bf16 %v874_v33, %v873_v32 }
 0x17d   : > { %v840_v36 = vpop.permute.xlu1 %839  ;;  %v834_v40 = vpop.permute.xlu0 %833 }
 0x17e   : > { %3704 = vst [vmem:[#allocation6 + $0x20] sm:$0xff] %v3600_v35   ;;  %v844_v39 = vmul.f32 %v4603_v34, %v840_v36  ;;  %v841_v45 = vmul.f32 %v4603_v34, %v834_v40 }
 0x180   : > { %v3595_v42 = vpack.c.bf16 %v844_v39, %v843_v38 }
 0x181   : > { %v836_v43 = vpop.permute.xlu1 %835  ;;  %v4053_v44 = vld [vmem:[#allocation6 + $0x28] sm:$0xff]  }
 0x182   : > { %3703 = vst [vmem:[#allocation6 + $0x8] sm:$0xff] %v3595_v42   ;;  %v842_v48 = vmul.f32 %v4603_v34, %v836_v43  ;;  %3813 = vmatprep.subr.bf16.mxu1 %v4053_v44 }
 0x183   : > { %3814 = vmatpush3.bf16.msra.mxu1 %v4053_v44 }
 0x184   : > { %v3590_v49 = vpack.c.bf16 %v842_v48, %v841_v45 }
 0x185   : > { %v4054_v50 = vld [vmem:[#allocation6 + $0x20] sm:$0xff]  }
 0x186   : > { %3591 = vst [vmem:[#allocation6] sm:$0xff] %v3590_v49   ;;  %3815 = vmatprep.subr.bf16.mxu1 %v4054_v50 }
 0x187   : > { %3816 = vmatpush3.bf16.msra.mxu1 %v4054_v50 }
 0x188   : > { %3817 = vmatprep.subr.bf16.mxu1 %v4055_v53 }
 0x189   : > { %v4057_v55 = vld [vmem:[#allocation6 + $0x8] sm:$0xff]  }
 0x18a   : > { %v942_v1 = vpop.permute.xlu0 %941 }
 0x18b   : > { %3818 = vmatpush3.bf16.msra.mxu1 %v4055_v53 }
 0x18c   : > { %3819 = vmatprep.subr.bf16.mxu1 %v4056_v54 }
 0x18d   : > { %v4058_v58 = vld [vmem:[#allocation6] sm:$0xff]  }
 0x18e   : > { %v947_v2 = vpop.permute.xlu1 %946  ;;  %v932_v5 = vpop.permute.xlu0 %931 }
 0x18f   : > { %3820 = vmatpush3.bf16.msra.mxu1 %v4056_v54 }
 0x190   : > { %3821 = vmatprep.subr.bf16.mxu1 %v4057_v55 }
 0x192   : > { %v937_v14 = vpop.permute.xlu1 %936  ;;  %v962_v26 = vpop.permute.xlu0 %961 }
 0x193   : > { %3822 = vmatpush3.bf16.msra.mxu1 %v4057_v55 }
 0x194   : > { %3823 = vmatprep.subr.bf16.mxu1 %v4058_v58 }
 0x196   : > { %v967_v32 = vpop.permute.xlu1 %966  ;;  %v952_v35 = vpop.permute.xlu0 %951 }
 0x197   : > { %3824 = vmatpush3.bf16.msra.mxu1 %v4058_v58 }
 0x19a   : > { %3826 = vmatmul.mubr.bf16.vlgmr.msra.gmra.mxu1 %v4060_v60  ;;  %v957_v43 = vpop.permute.xlu1 %956 }
 0x19b   : > { %3829 = vmatprep.mubr.bf16.mxu1 %v4061_v61 }
 0x1a2   : > { %3830 = vmatmul.mubr.bf16.gmra.mxu1 %v4062_v62 }
 0x25a   : > { %v3827_v3 = vpop.f32.mrf.mxu1 }
 0x25b   : > { %v1084_v4 = vadd.f32 %v3827_v3, %v942_v1 }
 0x25c   : > { %v1075_v7 = vpop.f32.mrf.mxu1 }
 0x25d   : > { %v1108_v8 = vmul.f32 %v4518_v37, %v1084_v4  ;;  %v1076_v9 = vadd.f32 %v1075_v7, %v932_v5 }
 0x25e   : > { %v3828_v10 = vpop.f32.mrf.mxu1 }
 0x25f   : > { %v3269_v11 = vmul.f32 -1.442695, %v1108_v8  ;;  %v1106_v12 = vmul.f32 %v4518_v37, %v1076_v9  ;;  %v1087_v13 = vadd.f32 %v3828_v10, %v947_v2 }
 0x260   : > { %v1078_v19 = vpop.f32.mrf.mxu1 }
 0x261   : > { %4117 = vpow2.f32 %v3269_v11  ;;  %v3267_v20 = vmul.f32 -1.442695, %v1106_v12  ;;  %v1109_v22 = vmul.f32 %v4518_v37, %v1087_v13  ;;  %v1079_v25 = vadd.f32 %v1078_v19, %v937_v14  ;;  %v4064_v14 = vld [vmem:[%s5174_s9 + $0x8] sm:$0xff]   ;;  %v1182_v19 = vpop.permute.xlu1 %1181 }
 0x262   : > { %v3831_v27 = vpop.f32.mrf.mxu1 }
 0x263   : > { %4119 = vpow2.f32 %v3267_v20  ;;  %v3270_v28 = vmul.f32 -1.442695, %v1109_v22  ;;  %v1107_v29 = vmul.f32 %v4518_v37, %v1079_v25  ;;  %v1100_v36 = vadd.f32 %v3831_v27, %v962_v26  ;;  %v1177_v20 = vpop.permute.xlu0 %1176 }
 0x264   : > { %v1091_v30 = vpop.f32.mrf.mxu1 }
 0x265   : > { %4121 = vpow2.f32 %v3270_v28  ;;  %v3268_v31 = vmul.f32 -1.442695, %v1107_v29  ;;  %v1092_v38 = vadd.f32 %v1091_v30, %v952_v35  ;;  %v1112_v42 = vmul.f32 %v4518_v37, %v1100_v36  ;;  %v1172_v22 = vpop.permute.xlu1 %1171 }
 0x266   : > { %v3832_v33 = vpop.f32.mrf.mxu1 }
 0x267   : > { %4123 = vpow2.f32 %v3268_v31  ;;  %v1103_v39 = vadd.f32 %v3832_v33, %v967_v32  ;;  %v1110_v44 = vmul.f32 %v4518_v37, %v1092_v38  ;;  %v1167_v27 = vpop.permute.xlu0 %1166 }
 0x268   : > { %v1094_v40 = vpop.f32.mrf.mxu1  ;;  %4125 = vtanh.f32 %v1112_v42 }
 0x269   : > { %v1113_v48 = vmul.f32 %v4518_v37, %v1103_v39  ;;  %v1095_v49 = vadd.f32 %v1094_v40, %v957_v43  ;;  %4127 = vtanh.f32 %v1110_v44  ;;  %v1336_v32 = vpop.permute.xlu1 %1335  ;;  %v4065_v40 = vld [vmem:[#allocation6 + $0x38] sm:$0xff]  }
 0x26b   : > { %4129 = vtanh.f32 %v1113_v48  ;;  %v1111_v58 = vmul.f32 %v4518_v37, %v1095_v49  ;;  %v1332_v39 = vpop.permute.xlu0 %1331 }
 0x26e   : > { %v4118_v45 = vpop.eup %4117 }
 0x26f   : > { %v1128_v50 = vadd.f32 1.0, %v4118_v45 }
 0x270   : > { %v4120_v53 = vpop.eup %4119 }
 0x271   : > { %v1126_v54 = vadd.f32 1.0, %v4120_v53  ;;  %4131 = vrcp.f32 %v1128_v50  ;;  %v1324_v50 = vpop.permute.xlu1 %1323  ;;  %v4066_v53 = vld [vmem:[#allocation6 + $0x30] sm:$0xff]  }
 0x272   : > { %v4122_v55 = vpop.eup %4121 }
 0x273   : > { %v1129_v60 = vadd.f32 1.0, %v4122_v55  ;;  %4133 = vrcp.f32 %v1126_v54  ;;  %v1328_v55 = vpop.permute.xlu0 %1327 }
 0x274   : > { %v4124_v61 = vpop.eup %4123 }
 0x275   : > { %4135 = vrcp.f32 %v1129_v60  ;;  %v1127_v62 = vadd.f32 1.0, %v4124_v61  ;;  %v4126_v63 = vpop.eup %4125 }
 0x276   : > { %4137 = vtanh.f32 %v1111_v58  ;;  %v4128_v0 = vpop.eup %4127 }
 0x277   : > { %4139 = vrcp.f32 %v1127_v62  ;;  %v4075_v62 = vld [vmem:[%s5172_s7 + $0x20] sm:$0xff]  }
 0x278   : > { %v4130_v1 = vpop.eup %4129 }
 0x27e   : > { %v4132_v2 = vpop.eup %4131 }
 0x27f   : > { %v1144_v7 = vmul.f32 %v4132_v2, %v4126_v63  ;;  %v3301_v63 = vld [vmem:[%s5173_s8 + $0x50] sm:$0xff] }
 0x280   : > { %v4134_v3 = vpop.eup %4133  ;;  %v3305_v2 = vld [vmem:[%s5173_s8 + $0x70] sm:$0xff] }
 0x281   : > { %v1142_v11 = vmul.f32 %v4134_v3, %v4128_v0  ;;  %v3302_v0 = vld [vmem:[%s5173_s8 + $0x58] sm:$0xff]  ;;  %v3300_v3 = vld [vmem:[%s5173_s8 + $0x48] sm:$0xff] }
 0x282   : > { %v4136_v4 = vpop.eup %4135 }
 0x283   : > { %v4138_v5 = vpop.eup %4137  ;;  %v1145_v8 = vmul.f32 %v4136_v4, %v4130_v1  ;;  %v3299_v1 = vld [vmem:[%s5173_s8 + $0x40] sm:$0xff] }
 0x284   : > { %v4140_v9 = vpop.eup %4139  ;;  %v3303_v4 = vld [vmem:[%s5173_s8 + $0x60] sm:$0xff] }
 0x285   : > { %v1155_v10 = vpack.c.bf16 %v1145_v8, %v1144_v7  ;;  %v1143_v12 = vmul.f32 %v4140_v9, %v4138_v5  ;;  %v3306_v5 = vld [vmem:[%s5173_s8 + $0x78] sm:$0xff]  ;;  %v3333_v7 = vld [vmem:[%s5175_s10 + $0x50] sm:$0xff]  ;;  %v3304_v8 = vld [vmem:[%s5173_s8 + $0x68] sm:$0xff] }
 0x286   : > { %v3331_v9 = vld [vmem:[%s5175_s10 + $0x40] sm:$0xff] }
 0x287   : > { %3833 = vmatprep.subr.bf16.mxu0 %v1155_v10  ;;  %v1154_v13 = vpack.c.bf16 %v1143_v12, %v1142_v11  ;;  %v3332_v11 = vld [vmem:[%s5175_s10 + $0x48] sm:$0xff] }
 0x288   : > { %3834 = vmatpush3.bf16.msra.mxu0 %v1155_v10  ;;  %v3334_v10 = vld [vmem:[%s5175_s10 + $0x58] sm:$0xff] }
 0x289   : > { %3835 = vmatprep.subr.bf16.mxu0 %v1154_v13 }
 0x28c   : > { %3836 = vmatpush3.bf16.msra.mxu0 %v1154_v13  ;;  %v4721_v13 = vsel %vm635_vm5, 1.0, %v4307_v23 }
 0x28d   : > { %3845 = vmatprep.subr.bf16.mxu0 %v4065_v40 }
 0x28f   : > { %3838 = vmatmul.mubr.msk.bf16.vlgmr.msra.gmra.mxu0 %vm1224_vm4, %v4064_v14 }
 0x290   : > { %3846 = vmatpush3.bf16.msra.mxu0 %v4065_v40  ;;  %3841 = vmatprep.mubr.msk.bf16.mxu0 %vm1224_vm4, %v4070_v57 }
 0x291   : > { %3847 = vmatprep.subr.bf16.mxu0 %v4066_v53 }
 0x294   : > { %3848 = vmatpush3.bf16.msra.mxu0 %v4066_v53  ;;  %v4076_v53 = vld [vmem:[%s5172_s7 + $0x28] sm:$0xff]  }
 0x34f   : > { %v3839_v25 = vpop.f32.mrf.mxu0 }
 0x350   : > { %v1280_v26 = vadd.f32 %v3839_v25, %v1177_v20 }
 0x351   : > { %v1271_v28 = vpop.f32.mrf.mxu0 }
 0x352   : > { %v1304_v29 = vmul.f32 %v4518_v37, %v1280_v26  ;;  %v1272_v30 = vadd.f32 %v1271_v28, %v1167_v27 }
 0x353   : > { %v3840_v31 = vpop.f32.mrf.mxu0 }
 0x354   : > { %v1302_v33 = vmul.f32 %v4518_v37, %v1272_v30  ;;  %v1283_v35 = vadd.f32 %v3840_v31, %v1182_v19  ;;  %v1312_v36 = vadd.f32 %v1304_v29, %v783_v46  ;;  %v4729_v30 = vsel %vm629_vm6, 1.0, %v4307_v23 }
 0x355   : > { %v1274_v38 = vpop.f32.mrf.mxu0 }
 0x356   : > { %v1305_v42 = vmul.f32 %v4518_v37, %v1283_v35  ;;  %v1275_v43 = vadd.f32 %v1274_v38, %v1172_v22  ;;  %v4645_v44 = vmul.f32 0.70710677, %v1312_v36  ;;  %v1310_v45 = vadd.f32 %v1302_v33, %v781_v51 }
 0x358   : > { %v1313_v48 = vadd.f32 %v1305_v42, %v784_v56  ;;  %v1303_v49 = vmul.f32 %v4518_v37, %v1275_v43  ;;  %v1340_v41 = vadd.f32 %v1332_v39, %v4645_v44  ;;  %v4653_v46 = vmul.f32 0.70710677, %v1310_v45 }
 0x35a   : > { %v4655_v54 = vmul.f32 0.70710677, %v1313_v48  ;;  %1398 = vrot.lane.b32.xlu1 %v1340_v41, %s4309_s25  ;;  %v1311_v47 = vadd.f32 %v1303_v49, %v782_v59  ;;  %v1338_v52 = vadd.f32 %v1324_v50, %v4653_v46  ;;  %v4071_v59 = vld [vmem:[%s5174_s9 + $0x18] sm:$0xff]  }
 0x35b   : > { %3842 = vmatmul.mubr.msk.bf16.gmra.mxu0 %vm1224_vm4, %v4071_v59 }
 0x35c   : > { %v1341_v51 = vadd.f32 %v1336_v32, %v4655_v54  ;;  %v4662_v56 = vmul.f32 0.70710677, %v1311_v47  ;;  %3861 = vmatprep.mubr.bf16.mxu0 %v4075_v62  ;;  %v4077_v47 = vld [vmem:[%s5172_s7 + $0x30] sm:$0xff]  }
 0x35e   : > { %v3615_v58 = vpack.c.bf16 %v1341_v51, %v1340_v41  ;;  %v1339_v60 = vadd.f32 %v1328_v55, %v4662_v56  ;;  %1400 = vrot.lane.b32.xlu0 %v1341_v51, %s4309_s25  ;;  %1394 = vrot.lane.b32.xlu1 %v1338_v52, %s4309_s25  ;;  %v4311_v55 = vmov 2  }
 0x360   : > { %3707 = vst [vmem:[#allocation6 + $0x18] sm:$0xff] %v3615_v58   ;;  %v3610_v61 = vpack.c.bf16 %v1339_v60, %v1338_v52 }
 0x362   : > { %3706 = vst [vmem:[#allocation6 + $0x10] sm:$0xff] %v3610_v61   ;;  %1396 = vrot.lane.b32.xlu0 %v1339_v60, %s4309_s25  ;;  %1366 = vrot.lane.b32.xlu1 %v1340_v41, %s5192_s20 }
 0x366   : > { %1368 = vrot.lane.b32.xlu0 %v1341_v51, %s5192_s20  ;;  %1362 = vrot.lane.b32.xlu1 %v1338_v52, %s5192_s20  ;;  %v4078_v51 = vld [vmem:[%s5172_s7 + $0x38] sm:$0xff]   ;;  %v4079_v52 = vld [vmem:[%s5174_s9 + $0x20] sm:$0xff]  }
 0x367   : > { %v4069_v48 = vld [vmem:[#allocation6 + $0x18] sm:$0xff]   ;;  %3873 = vmatprep.mubr.msk.bf16.mxu1 %vm1224_vm4, %v4079_v52 }
 0x369   : > { %v4072_v49 = vld [vmem:[#allocation6 + $0x10] sm:$0xff]  }
 0x36a   : > { %1364 = vrot.lane.b32.xlu0 %v1339_v60, %s5192_s20  ;;  %1472 = vperm.xlu1 %4039, %v3301_v63   ;;  %s4222_s20 = sshll.u32 %s4314_s23, 4  ;;  %s4223_s20 = int_to_ptr.vmem [resolvable:$false] %s4222_s20 }
 0x36e   : > { %1477 = vperm.xlu0 %4040, %v3302_v0   ;;  %1462 = vperm.xlu1 %4039, %v3299_v1  }
 0x372   : > { %1492 = vperm.xlu0 %4040, %v3305_v2   ;;  %1467 = vperm.xlu1 %4039, %v3300_v3  }
 0x376   : > { %1482 = vperm.xlu0 %4040, %v3303_v4   ;;  %1497 = vperm.xlu1 %4039, %v3306_v5  }
 0x37a   : > { %1709 = vperm.xlu0 %4040, %v3333_v7   ;;  %1487 = vperm.xlu1 %4039, %v3304_v8  }
 0x37e   : > { %1699 = vperm.xlu0 %4040, %v3331_v9   ;;  %1714 = vperm.xlu1 %4039, %v3334_v10  }
 0x382   : > { %1704 = vperm.xlu1 %4039, %v3332_v11   ;;  %4041 = vset.pattern.permute.xlu0 %v4311_v55 }
 0x383   : > { %1863 = vperm.xlu0 %4041, %v4501_v15  }
 0x386   : > { %4042 = vset.pattern.permute.xlu1 %v4311_v55 }
 0x387   : > { %1867 = vperm.xlu1 %4042, %v4504_v16   ;;  %1859 = vperm.xlu0 %4041, %v4511_v18  }
 0x38b   : > { %1855 = vperm.xlu1 %4042, %v4507_v17   ;;  %4044 = vset.pattern.permute.xlu0 %v4304_v6 }
 0x38f   : > { %4043 = vset.pattern.permute.xlu1 %v4304_v6 }
 0x3cc   : > { %v1399_v12 = vpop.permute.xlu1 %1398 }
 0x3cd   : > { %v1404_v20 = vmul.f32 %v4721_v13, %v1399_v12 }
 0x3d0   : > { %v1401_v14 = vpop.permute.xlu0 %1400  ;;  %v1395_v19 = vpop.permute.xlu1 %1394 }
 0x3d1   : > { %v1405_v22 = vmul.f32 %v4721_v13, %v1401_v14  ;;  %v1402_v28 = vmul.f32 %v4721_v13, %v1395_v19 }
 0x3d3   : > { %v3635_v25 = vpack.c.bf16 %v1405_v22, %v1404_v20 }
 0x3d4   : > { %v1397_v26 = vpop.permute.xlu0 %1396  ;;  %v1367_v27 = vpop.permute.xlu1 %1366 }
 0x3d5   : > { %3710 = vst [vmem:[#allocation6 + $0x28] sm:$0xff] %v3635_v25   ;;  %v1403_v29 = vmul.f32 %v4721_v13, %v1397_v26  ;;  %v1372_v33 = vmul.f32 %v4729_v30, %v1367_v27 }
 0x3d7   : > { %v3630_v31 = vpack.c.bf16 %v1403_v29, %v1402_v28 }
 0x3d8   : > { %v1369_v32 = vpop.permute.xlu0 %1368  ;;  %v1363_v36 = vpop.permute.xlu1 %1362 }
 0x3d9   : > { %3709 = vst [vmem:[#allocation6 + $0x20] sm:$0xff] %v3630_v31   ;;  %v1373_v35 = vmul.f32 %v4729_v30, %v1369_v32  ;;  %v1370_v40 = vmul.f32 %v4729_v30, %v1363_v36 }
 0x3db   : > { %v3625_v38 = vpack.c.bf16 %v1373_v35, %v1372_v33 }
 0x3dc   : > { %v1365_v21 = vpop.permute.xlu0 %1364  ;;  %v4067_v39 = vld [vmem:[#allocation6 + $0x28] sm:$0xff]  }
 0x3dd   : > { %3708 = vst [vmem:[#allocation6 + $0x8] sm:$0xff] %v3625_v38   ;;  %v1371_v42 = vmul.f32 %v4729_v30, %v1365_v21  ;;  %3849 = vmatprep.subr.bf16.mxu0 %v4067_v39 }
 0x3de   : > { %3850 = vmatpush3.bf16.msra.mxu0 %v4067_v39 }
 0x3df   : > { %v3620_v43 = vpack.c.bf16 %v1371_v42, %v1370_v40 }
 0x3e0   : > { %v4068_v45 = vld [vmem:[#allocation6 + $0x20] sm:$0xff]  }
 0x3e1   : > { %3621 = vst [vmem:[#allocation6] sm:$0xff] %v3620_v43   ;;  %3851 = vmatprep.subr.bf16.mxu0 %v4068_v45 }
 0x3e2   : > { %3852 = vmatpush3.bf16.msra.mxu0 %v4068_v45 }
 0x3e3   : > { %3853 = vmatprep.subr.bf16.mxu0 %v4069_v48 }
 0x3e4   : > { %v4073_v41 = vld [vmem:[#allocation6 + $0x8] sm:$0xff]  }
 0x3e5   : > { %v1473_v61 = vpop.permute.xlu1 %1472 }
 0x3e6   : > { %3854 = vmatpush3.bf16.msra.mxu0 %v4069_v48 }
 0x3e7   : > { %3855 = vmatprep.subr.bf16.mxu0 %v4072_v49 }
 0x3e8   : > { %v4074_v50 = vld [vmem:[#allocation6] sm:$0xff]  }
 0x3e9   : > { %v1463_v16 = vpop.permute.xlu1 %1462  ;;  %v1478_v63 = vpop.permute.xlu0 %1477 }
 0x3ea   : > { %3856 = vmatpush3.bf16.msra.mxu0 %v4072_v49 }
 0x3eb   : > { %3857 = vmatprep.subr.bf16.mxu0 %v4073_v41 }
 0x3ed   : > { %v1468_v5 = vpop.permute.xlu1 %1467  ;;  %v1493_v11 = vpop.permute.xlu0 %1492 }
 0x3ee   : > { %3858 = vmatpush3.bf16.msra.mxu0 %v4073_v41 }
 0x3ef   : > { %3859 = vmatprep.subr.bf16.mxu0 %v4074_v50 }
 0x3f1   : > { %v1498_v25 = vpop.permute.xlu1 %1497  ;;  %v1483_v27 = vpop.permute.xlu0 %1482 }
 0x3f2   : > { %3860 = vmatpush3.bf16.msra.mxu0 %v4074_v50 }
 0x3f5   : > { %3862 = vmatmul.mubr.bf16.vlgmr.msra.gmra.mxu0 %v4076_v53  ;;  %v1488_v35 = vpop.permute.xlu1 %1487 }
 0x3f6   : > { %3865 = vmatprep.mubr.bf16.mxu0 %v4077_v47 }
 0x3fd   : > { %3866 = vmatmul.mubr.bf16.gmra.mxu0 %v4078_v51 }
 0x41b   : > { %v4754_v58 = vpop.f32.mrf.mxu0 }
 0x41d   : > { %v4756_v60 = vpop.f32.mrf.mxu0 }
 0x41f   : > { %v4758_v57 = vpop.f32.mrf.mxu0 }
 0x421   : > { %v4760_v59 = vpop.f32.mrf.mxu0 }
 0x4b5   : > { %v3863_v62 = vpop.f32.mrf.mxu0 }
 0x4b6   : > { %v1615_v15 = vadd.f32 %v3863_v62, %v1473_v61 }
 0x4b7   : > { %v1606_v17 = vpop.f32.mrf.mxu0 }
 0x4b8   : > { %v1639_v18 = vmul.f32 %v4518_v37, %v1615_v15  ;;  %v1607_v0 = vadd.f32 %v1606_v17, %v1463_v16 }
 0x4b9   : > { %v3864_v1 = vpop.f32.mrf.mxu0 }
 0x4ba   : > { %v3321_v2 = vmul.f32 -1.442695, %v1639_v18  ;;  %v1637_v3 = vmul.f32 %v4518_v37, %v1607_v0  ;;  %v1618_v4 = vadd.f32 %v3864_v1, %v1478_v63 }
 0x4bb   : > { %v1609_v7 = vpop.f32.mrf.mxu0 }
 0x4bc   : > { %4141 = vpow2.f32 %v3321_v2  ;;  %v3319_v8 = vmul.f32 -1.442695, %v1637_v3  ;;  %v1640_v9 = vmul.f32 %v4518_v37, %v1618_v4  ;;  %v1610_v10 = vadd.f32 %v1609_v7, %v1468_v5  ;;  %v4080_v2 = vld [vmem:[%s5174_s9 + $0x28] sm:$0xff]   ;;  %v1715_v3 = vpop.permute.xlu1 %1714  ;;  %v1710_v4 = vpop.permute.xlu0 %1709 }
 0x4bd   : > { %v3867_v12 = vpop.f32.mrf.mxu0 }
 0x4be   : > { %4143 = vpow2.f32 %v3319_v8  ;;  %v3322_v14 = vmul.f32 -1.442695, %v1640_v9  ;;  %v1638_v19 = vmul.f32 %v4518_v37, %v1610_v10  ;;  %v1631_v28 = vadd.f32 %v3867_v12, %v1493_v11 }
 0x4bf   : > { %v1622_v20 = vpop.f32.mrf.mxu0 }
 0x4c0   : > { %4145 = vpow2.f32 %v3322_v14  ;;  %v3320_v22 = vmul.f32 -1.442695, %v1638_v19  ;;  %v1623_v29 = vadd.f32 %v1622_v20, %v1483_v27  ;;  %v1643_v33 = vmul.f32 %v4518_v37, %v1631_v28  ;;  %v1705_v5 = vpop.permute.xlu1 %1704  ;;  %v1700_v9 = vpop.permute.xlu0 %1699  ;;  %v4081_v28 = vld [vmem:[#allocation6 + $0x38] sm:$0xff]  }
 0x4c1   : > { %v3868_v26 = vpop.f32.mrf.mxu0  ;;  %3881 = vmatprep.subr.bf16.mxu0 %v4081_v28 }
 0x4c2   : > { %4147 = vpow2.f32 %v3320_v22  ;;  %v1634_v31 = vadd.f32 %v3868_v26, %v1498_v25  ;;  %v1641_v36 = vmul.f32 %v4518_v37, %v1623_v29  ;;  %3882 = vmatpush3.bf16.msra.mxu0 %v4081_v28 }
 0x4c3   : > { %v1625_v32 = vpop.f32.mrf.mxu0  ;;  %4149 = vtanh.f32 %v1643_v33 }
 0x4c4   : > { %v1644_v21 = vmul.f32 %v4518_v37, %v1634_v31  ;;  %v1626_v39 = vadd.f32 %v1625_v32, %v1488_v35  ;;  %4151 = vtanh.f32 %v1641_v36  ;;  %v1868_v19 = vpop.permute.xlu1 %1867  ;;  %v1864_v27 = vpop.permute.xlu0 %1863 }
 0x4c6   : > { %4153 = vtanh.f32 %v1644_v21  ;;  %v1642_v48 = vmul.f32 %v4518_v37, %v1626_v39  ;;  %v4082_v39 = vld [vmem:[#allocation6 + $0x30] sm:$0xff]  }
 0x4c7   : > { %3883 = vmatprep.subr.bf16.mxu0 %v4082_v39 }
 0x4c8   : > { %3884 = vmatpush3.bf16.msra.mxu0 %v4082_v39  ;;  %v4095_v39 = vld [vmem:[%s5174_s9 + $0x40] sm:$0xff]  }
 0x4c9   : > { %v4142_v38 = vpop.eup %4141 }
 0x4ca   : > { %v1659_v40 = vadd.f32 1.0, %v4142_v38 }
 0x4cb   : > { %v4144_v42 = vpop.eup %4143 }
 0x4cc   : > { %v1657_v43 = vadd.f32 1.0, %v4144_v42  ;;  %4155 = vrcp.f32 %v1659_v40 }
 0x4cd   : > { %v4146_v45 = vpop.eup %4145 }
 0x4ce   : > { %v1660_v49 = vadd.f32 1.0, %v4146_v45  ;;  %4157 = vrcp.f32 %v1657_v43 }
 0x4cf   : > { %v4148_v41 = vpop.eup %4147 }
 0x4d0   : > { %4159 = vrcp.f32 %v1660_v49  ;;  %v1658_v50 = vadd.f32 1.0, %v4148_v41  ;;  %v4150_v53 = vpop.eup %4149  ;;  %v3369_v41 = vld [vmem:[%s5173_s8 + $0x90] sm:$0xff] }
 0x4d1   : > { %4161 = vtanh.f32 %v1642_v48  ;;  %v4152_v47 = vpop.eup %4151 }
 0x4d2   : > { %4163 = vrcp.f32 %v1658_v50  ;;  %v3370_v50 = vld [vmem:[%s5173_s8 + $0x98] sm:$0xff] }
 0x4d3   : > { %v4154_v51 = vpop.eup %4153 }
 0x4d9   : > { %v4156_v52 = vpop.eup %4155 }
 0x4da   : > { %v1675_v62 = vmul.f32 %v4156_v52, %v4150_v53  ;;  %v3367_v53 = vld [vmem:[%s5173_s8 + $0x80] sm:$0xff] }
 0x4db   : > { %v4158_v55 = vpop.eup %4157  ;;  %v3371_v52 = vld [vmem:[%s5173_s8 + $0xa0] sm:$0xff] }
 0x4dc   : > { %v1673_v18 = vmul.f32 %v4158_v55, %v4152_v47  ;;  %v3373_v47 = vld [vmem:[%s5173_s8 + $0xb0] sm:$0xff]  ;;  %v3374_v55 = vld [vmem:[%s5173_s8 + $0xb8] sm:$0xff] }
 0x4dd   : > { %v4160_v61 = vpop.eup %4159 }
 0x4de   : > { %v4162_v16 = vpop.eup %4161  ;;  %v1676_v15 = vmul.f32 %v4160_v61, %v4154_v51  ;;  %v3368_v51 = vld [vmem:[%s5173_s8 + $0x88] sm:$0xff]  ;;  %v3401_v61 = vld [vmem:[%s5175_s10 + $0x90] sm:$0xff] }
 0x4df   : > { %v4164_v63 = vpop.eup %4163 }
 0x4e0   : > { %v1687_v17 = vpack.c.bf16 %v1676_v15, %v1675_v62  ;;  %v1674_v0 = vmul.f32 %v4164_v63, %v4162_v16  ;;  %v3372_v16 = vld [vmem:[%s5173_s8 + $0xa8] sm:$0xff]  ;;  %v3399_v62 = vld [vmem:[%s5175_s10 + $0x80] sm:$0xff]  ;;  %v3402_v15 = vld [vmem:[%s5175_s10 + $0x98] sm:$0xff] }
 0x4e1   : > { %v3400_v63 = vld [vmem:[%s5175_s10 + $0x88] sm:$0xff] }
 0x4e2   : > { %3869 = vmatprep.subr.bf16.mxu1 %v1687_v17  ;;  %v1686_v1 = vpack.c.bf16 %v1674_v0, %v1673_v18 }
 0x4e3   : > { %3870 = vmatpush3.bf16.msra.mxu1 %v1687_v17 }
 0x4e4   : > { %3871 = vmatprep.subr.bf16.mxu1 %v1686_v1 }
 0x4e7   : > { %3872 = vmatpush3.bf16.msra.mxu1 %v1686_v1 }
 0x4ea   : > { %3874 = vmatmul.mubr.msk.bf16.vlgmr.msra.gmra.mxu1 %vm1224_vm4, %v4080_v2 }
 0x5aa   : > { %v3875_v7 = vpop.f32.mrf.mxu1 }
 0x5ab   : > { %v1812_v8 = vadd.f32 %v3875_v7, %v1710_v4 }
 0x5ac   : > { %v1803_v10 = vpop.f32.mrf.mxu1 }
 0x5ad   : > { %v1836_v11 = vmul.f32 %v4518_v37, %v1812_v8  ;;  %v1804_v12 = vadd.f32 %v1803_v10, %v1700_v9 }
 0x5ae   : > { %v3876_v14 = vpop.f32.mrf.mxu1 }
 0x5af   : > { %v1834_v20 = vmul.f32 %v4518_v37, %v1804_v12  ;;  %v1815_v22 = vadd.f32 %v3876_v14, %v1715_v3  ;;  %v1844_v25 = vadd.f32 %v1836_v11, %v4645_v44  ;;  %v1856_v44 = vpop.permute.xlu1 %1855 }
 0x5b0   : > { %v1806_v26 = vpop.f32.mrf.mxu1 }
 0x5b1   : > { %v1837_v29 = vmul.f32 %v4518_v37, %v1815_v22  ;;  %v1807_v31 = vadd.f32 %v1806_v26, %v1705_v5  ;;  %v4778_v32 = vmul.f32 0.70710677, %v1844_v25  ;;  %v1842_v33 = vadd.f32 %v1834_v20, %v4653_v46 }
 0x5b3   : > { %v1845_v35 = vadd.f32 %v1837_v29, %v4655_v54  ;;  %v1835_v36 = vmul.f32 %v4518_v37, %v1807_v31  ;;  %v1872_v38 = vadd.f32 %v1864_v27, %v4778_v32  ;;  %v4784_v21 = vmul.f32 0.70710677, %v1842_v33  ;;  %v1860_v37 = vpop.permute.xlu0 %1859 }
 0x5b5   : > { %v4786_v40 = vmul.f32 0.70710677, %v1845_v35  ;;  %1930 = vrot.lane.b32.xlu1 %v1872_v38, %s4305_s13  ;;  %v1843_v42 = vadd.f32 %v1835_v36, %v4662_v56  ;;  %v1870_v54 = vadd.f32 %v1856_v44, %v4784_v21  ;;  %v4089_v56 = vld [vmem:[%s5172_s7 + $0x40] sm:$0xff]   ;;  %v4091_v35 = vld [vmem:[%s5172_s7 + $0x50] sm:$0xff]   ;;  %v4092_v36 = vld [vmem:[%s5172_s7 + $0x58] sm:$0xff]  }
 0x5b6   : > { %3897 = vmatprep.mubr.bf16.mxu0 %v4089_v56  ;;  %v4094_v44 = vld [vmem:[%s5174_s9 + $0x38] sm:$0xff]  }
 0x5b7   : > { %v1873_v46 = vadd.f32 %v1868_v19, %v4786_v40  ;;  %v4792_v43 = vmul.f32 0.70710677, %v1843_v42  ;;  %v4312_v42 = vmov 3  }
 0x5b9   : > { %v3645_v45 = vpack.c.bf16 %v1873_v46, %v1872_v38  ;;  %v1871_v48 = vadd.f32 %v1860_v37, %v4792_v43  ;;  %1932 = vrot.lane.b32.xlu0 %v1873_v46, %s4305_s13  ;;  %1926 = vrot.lane.b32.xlu1 %v1870_v54, %s4305_s13  ;;  %v4215_v37 = vld [vmem:[%s4464_s18] sm:$0xff] }
 0x5bb   : > { %3712 = vst [vmem:[#allocation6 + $0x18] sm:$0xff] %v3645_v45   ;;  %v3640_v49 = vpack.c.bf16 %v1871_v48, %v1870_v54  ;;  %v4216_v45 = vld [vmem:[%s4464_s18 + $0x8] sm:$0xff] }
 0x5bd   : > { %3711 = vst [vmem:[#allocation6 + $0x10] sm:$0xff] %v3640_v49   ;;  %1928 = vrot.lane.b32.xlu0 %v1871_v48, %s4305_s13  ;;  %1898 = vrot.lane.b32.xlu1 %v1872_v38, %s4306_s15  ;;  %v4093_v38 = vld [vmem:[%s5174_s9 + $0x30] sm:$0xff]  }
 0x5be   : > { %3877 = vmatprep.mubr.msk.bf16.mxu1 %vm1224_vm4, %v4093_v38 }
 0x5bf   : > { %3878 = vmatmul.mubr.msk.bf16.gmra.mxu1 %vm1224_vm4, %v4094_v44 }
 0x5c0   : > { %3909 = vmatprep.mubr.msk.bf16.mxu1 %vm1224_vm4, %v4095_v39 }
 0x5c1   : > { %1900 = vrot.lane.b32.xlu0 %v1873_v46, %s4306_s15  ;;  %1894 = vrot.lane.b32.xlu1 %v1870_v54, %s4306_s15  ;;  %v4213_v46 = vld [vmem:[%s4464_s18 + $0x18] sm:$0xff]  ;;  %v4214_v54 = vld [vmem:[%s4464_s18 + $0x10] sm:$0xff] }
 0x5c2   : > { %v4085_v28 = vld [vmem:[#allocation6 + $0x18] sm:$0xff]  }
 0x5c4   : > { %v4086_v29 = vld [vmem:[#allocation6 + $0x10] sm:$0xff]  }
 0x5c5   : > { %1896 = vrot.lane.b32.xlu0 %v1871_v48, %s4306_s15  ;;  %2004 = vperm.xlu1 %4043, %v3369_v41  }
 0x5c9   : > { %2009 = vperm.xlu0 %4044, %v3370_v50   ;;  %1994 = vperm.xlu1 %4043, %v3367_v53  }
 0x5cd   : > { %2024 = vperm.xlu0 %4044, %v3373_v47   ;;  %1999 = vperm.xlu1 %4043, %v3368_v51   ;;  %v4876_v47 = vld [vmem:[#allocation5] ss:$0 sm:$0xff] }
 0x5d1   : > { %2014 = vperm.xlu0 %4044, %v3371_v52   ;;  %2029 = vperm.xlu1 %4043, %v3374_v55  }
 0x5d5   : > { %2241 = vperm.xlu0 %4044, %v3401_v61   ;;  %2019 = vperm.xlu1 %4043, %v3372_v16  }
 0x5d9   : > { %2231 = vperm.xlu0 %4044, %v3399_v62   ;;  %2246 = vperm.xlu1 %4043, %v3402_v15  }
 0x5dd   : > { %2236 = vperm.xlu1 %4043, %v3400_v63   ;;  %4045 = vset.pattern.permute.xlu0 %v4312_v42 }
 0x5de   : > { %2395 = vperm.xlu0 %4045, %v4214_v54  }
 0x5e1   : > { %4046 = vset.pattern.permute.xlu1 %v4312_v42 }
 0x5e2   : > { %2399 = vperm.xlu1 %4046, %v4213_v46   ;;  %2391 = vperm.xlu0 %4045, %v4216_v45  }
 0x5e6   : > { %2387 = vperm.xlu1 %4046, %v4215_v37   ;;  %4048 = vset.pattern.permute.xlu0 %v4304_v6 }
 0x5ea   : > { %4047 = vset.pattern.permute.xlu1 %v4304_v6 }
 0x627   : > { %v1931_v17 = vpop.permute.xlu1 %1930 }
 0x628   : > { %v1936_v1 = vmul.f32 %v4595_v24, %v1931_v17 }
 0x62b   : > { %v1933_v18 = vpop.permute.xlu0 %1932  ;;  %v1927_v0 = vpop.permute.xlu1 %1926 }
 0x62c   : > { %v1937_v2 = vmul.f32 %v4595_v24, %v1933_v18  ;;  %v1934_v7 = vmul.f32 %v4595_v24, %v1927_v0 }
 0x62e   : > { %v3665_v3 = vpack.c.bf16 %v1937_v2, %v1936_v1 }
 0x62f   : > { %v1929_v4 = vpop.permute.xlu0 %1928  ;;  %v1899_v5 = vpop.permute.xlu1 %1898 }
 0x630   : > { %3715 = vst [vmem:[#allocation6 + $0x28] sm:$0xff] %v3665_v3   ;;  %v1935_v8 = vmul.f32 %v4595_v24, %v1929_v4  ;;  %v1904_v11 = vmul.f32 %v4603_v34, %v1899_v5 }
 0x632   : > { %v3660_v9 = vpack.c.bf16 %v1935_v8, %v1934_v7 }
 0x633   : > { %v1901_v10 = vpop.permute.xlu0 %1900  ;;  %v1895_v14 = vpop.permute.xlu1 %1894 }
 0x634   : > { %3714 = vst [vmem:[#allocation6 + $0x20] sm:$0xff] %v3660_v9   ;;  %v1905_v12 = vmul.f32 %v4603_v34, %v1901_v10  ;;  %v1902_v25 = vmul.f32 %v4603_v34, %v1895_v14 }
 0x636   : > { %v3655_v19 = vpack.c.bf16 %v1905_v12, %v1904_v11 }
 0x637   : > { %v1897_v20 = vpop.permute.xlu0 %1896  ;;  %v4083_v22 = vld [vmem:[#allocation6 + $0x28] sm:$0xff]  }
 0x638   : > { %3713 = vst [vmem:[#allocation6 + $0x8] sm:$0xff] %v3655_v19   ;;  %v1903_v26 = vmul.f32 %v4603_v34, %v1897_v20  ;;  %3885 = vmatprep.subr.bf16.mxu0 %v4083_v22  ;;  %v4090_v34 = vld [vmem:[%s5172_s7 + $0x48] sm:$0xff]  }
 0x639   : > { %3886 = vmatpush3.bf16.msra.mxu0 %v4083_v22 }
 0x63a   : > { %v3650_v27 = vpack.c.bf16 %v1903_v26, %v1902_v25 }
 0x63b   : > { %v4084_v24 = vld [vmem:[#allocation6 + $0x20] sm:$0xff]  }
 0x63c   : > { %3651 = vst [vmem:[#allocation6] sm:$0xff] %v3650_v27   ;;  %3887 = vmatprep.subr.bf16.mxu0 %v4084_v24 }
 0x63d   : > { %3888 = vmatpush3.bf16.msra.mxu0 %v4084_v24 }
 0x63e   : > { %3889 = vmatprep.subr.bf16.mxu0 %v4085_v28 }
 0x63f   : > { %v4087_v31 = vld [vmem:[#allocation6 + $0x8] sm:$0xff]  }
 0x640   : > { %v2005_v48 = vpop.permute.xlu1 %2004 }
 0x641   : > { %3890 = vmatpush3.bf16.msra.mxu0 %v4085_v28 }
 0x642   : > { %3891 = vmatprep.subr.bf16.mxu0 %v4086_v29 }
 0x643   : > { %v4088_v33 = vld [vmem:[#allocation6] sm:$0xff]  }
 0x644   : > { %v1995_v49 = vpop.permute.xlu1 %1994  ;;  %v2010_v50 = vpop.permute.xlu0 %2009 }
 0x645   : > { %3892 = vmatpush3.bf16.msra.mxu0 %v4086_v29 }
 0x646   : > { %3893 = vmatprep.subr.bf16.mxu0 %v4087_v31 }
 0x648   : > { %v2000_v15 = vpop.permute.xlu1 %1999  ;;  %v2025_v0 = vpop.permute.xlu0 %2024 }
 0x649   : > { %3894 = vmatpush3.bf16.msra.mxu0 %v4087_v31 }
 0x64a   : > { %3895 = vmatprep.subr.bf16.mxu0 %v4088_v33 }
 0x64c   : > { %v2030_v7 = vpop.permute.xlu1 %2029  ;;  %v2015_v9 = vpop.permute.xlu0 %2014 }
 0x64d   : > { %3896 = vmatpush3.bf16.msra.mxu0 %v4088_v33 }
 0x650   : > { %3898 = vmatmul.mubr.bf16.vlgmr.msra.gmra.mxu0 %v4090_v34  ;;  %v2020_v20 = vpop.permute.xlu1 %2019 }
 0x651   : > { %3901 = vmatprep.mubr.bf16.mxu0 %v4091_v35 }
 0x658   : > { %3902 = vmatmul.mubr.bf16.gmra.mxu0 %v4092_v36 }
 0x710   : > { %v3899_v56 = vpop.f32.mrf.mxu0 }
 0x711   : > { %v2147_v41 = vadd.f32 %v3899_v56, %v2005_v48 }
 0x712   : > { %v2138_v53 = vpop.f32.mrf.mxu0 }
 0x713   : > { %v2171_v51 = vmul.f32 %v4876_v47, %v2147_v41  ;;  %v2139_v52 = vadd.f32 %v2138_v53, %v1995_v49 }
 0x714   : > { %v3900_v55 = vpop.f32.mrf.mxu0 }
 0x715   : > { %v3389_v61 = vmul.f32 -1.442695, %v2171_v51  ;;  %v2169_v16 = vmul.f32 %v4876_v47, %v2139_v52  ;;  %v2150_v62 = vadd.f32 %v3900_v55, %v2010_v50  ;;  %v4096_v51 = vld [vmem:[%s5174_s9 + $0x48] sm:$0xff]   ;;  %v4097_v52 = vld [vmem:[%s5174_s9 + $0x50] sm:$0xff]   ;;  %v4098_v55 = vld [vmem:[%s5174_s9 + $0x58] sm:$0xff]  }
 0x716   : > { %v2141_v63 = vpop.f32.mrf.mxu0 }
 0x717   : > { %4165 = vpow2.f32 %v3389_v61  ;;  %v3387_v6 = vmul.f32 -1.442695, %v2169_v16  ;;  %v2172_v17 = vmul.f32 %v4876_v47, %v2150_v62  ;;  %v2142_v18 = vadd.f32 %v2141_v63, %v2000_v15  ;;  %v4898_v61 = vpop.f32.mrf.mxu1  ;;  %v2247_v62 = vpop.permute.xlu1 %2246 }
 0x718   : > { %v3903_v1 = vpop.f32.mrf.mxu0  ;;  %v2242_v63 = vpop.permute.xlu0 %2241 }
 0x719   : > { %4167 = vpow2.f32 %v3387_v6  ;;  %v3390_v2 = vmul.f32 -1.442695, %v2172_v17  ;;  %v2170_v3 = vmul.f32 %v4876_v47, %v2142_v18  ;;  %v2163_v10 = vadd.f32 %v3903_v1, %v2025_v0  ;;  %v4900_v16 = vpop.f32.mrf.mxu1 }
 0x71a   : > { %v2154_v4 = vpop.f32.mrf.mxu0 }
 0x71b   : > { %4169 = vpow2.f32 %v3390_v2  ;;  %v3388_v5 = vmul.f32 -1.442695, %v2170_v3  ;;  %v2155_v11 = vadd.f32 %v2154_v4, %v2015_v9  ;;  %v2175_v19 = vmul.f32 %v4876_v47, %v2163_v10  ;;  %v4902_v15 = vpop.f32.mrf.mxu1  ;;  %v2237_v17 = vpop.permute.xlu1 %2236 }
 0x71c   : > { %v3904_v8 = vpop.f32.mrf.mxu0  ;;  %v2232_v1 = vpop.permute.xlu0 %2231 }
 0x71d   : > { %4171 = vpow2.f32 %v3388_v5  ;;  %v2166_v12 = vadd.f32 %v3904_v8, %v2030_v7  ;;  %v2173_v22 = vmul.f32 %v4876_v47, %v2155_v11  ;;  %v4904_v6 = vpop.f32.mrf.mxu1 }
 0x71e   : > { %v2157_v14 = vpop.f32.mrf.mxu0  ;;  %4173 = vtanh.f32 %v2175_v19 }
 0x71f   : > { %v2176_v26 = vmul.f32 %v4876_v47, %v2166_v12  ;;  %v2158_v27 = vadd.f32 %v2157_v14, %v2020_v20  ;;  %4175 = vtanh.f32 %v2173_v22  ;;  %v2400_v7 = vpop.permute.xlu1 %2399  ;;  %v4099_v14 = vld [vmem:[#allocation6 + $0x38] sm:$0xff]  }
 0x720   : > { %v2396_v12 = vpop.permute.xlu0 %2395 }
 0x721   : > { %4177 = vtanh.f32 %v2176_v26  ;;  %v2174_v33 = vmul.f32 %v4876_v47, %v2158_v27 }
 0x724   : > { %v4166_v25 = vpop.eup %4165 }
 0x725   : > { %v2191_v24 = vadd.f32 1.0, %v4166_v25 }
 0x726   : > { %v4168_v28 = vpop.eup %4167 }
 0x727   : > { %v2189_v29 = vadd.f32 1.0, %v4168_v28  ;;  %4179 = vrcp.f32 %v2191_v24 }
 0x728   : > { %v4170_v31 = vpop.eup %4169 }
 0x729   : > { %v2192_v34 = vadd.f32 1.0, %v4170_v31  ;;  %4181 = vrcp.f32 %v2189_v29  ;;  %v2388_v29 = vpop.permute.xlu1 %2387  ;;  %v4100_v31 = vld [vmem:[#allocation6 + $0x30] sm:$0xff]  }
 0x72a   : > { %v4172_v35 = vpop.eup %4171 }
 0x72b   : > { %4183 = vrcp.f32 %v2192_v34  ;;  %v2190_v36 = vadd.f32 1.0, %v4172_v35  ;;  %v4174_v38 = vpop.eup %4173 }
 0x72c   : > { %4185 = vtanh.f32 %v2174_v33  ;;  %v4176_v44 = vpop.eup %4175 }
 0x72d   : > { %4187 = vrcp.f32 %v2190_v36 }
 0x72e   : > { %v4178_v39 = vpop.eup %4177 }
 0x734   : > { %v4180_v42 = vpop.eup %4179 }
 0x735   : > { %v2207_v45 = vmul.f32 %v4180_v42, %v4174_v38  ;;  %v3435_v42 = vld [vmem:[%s5173_s8 + $0xc0] sm:$0xff] }
 0x736   : > { %v4182_v46 = vpop.eup %4181 }
 0x737   : > { %v2205_v41 = vmul.f32 %v4182_v46, %v4176_v44  ;;  %v3441_v46 = vld [vmem:[%s5173_s8 + $0xf0] sm:$0xff] }
 0x738   : > { %v4184_v54 = vpop.eup %4183 }
 0x739   : > { %v4186_v37 = vpop.eup %4185  ;;  %v2208_v48 = vmul.f32 %v4184_v54, %v4178_v39  ;;  %v3438_v39 = vld [vmem:[%s5173_s8 + $0xd8] sm:$0xff]  ;;  %v3436_v54 = vld [vmem:[%s5173_s8 + $0xc8] sm:$0xff] }
 0x73a   : > { %v4188_v49 = vpop.eup %4187 }
 0x73b   : > { %v2219_v56 = vpack.c.bf16 %v2208_v48, %v2207_v45  ;;  %v2206_v50 = vmul.f32 %v4188_v49, %v4186_v37  ;;  %v3439_v37 = vld [vmem:[%s5173_s8 + $0xe0] sm:$0xff]  ;;  %v3442_v45 = vld [vmem:[%s5173_s8 + $0xf8] sm:$0xff]  ;;  %v1162_v49 = vld [vmem:[%s5175_s10 + $0x30] sm:$0xff] }
 0x73c   : > { %v4107_v48 = vld [vmem:[%s5172_s7 + $0x60] sm:$0xff]  }
 0x73d   : > { %3905 = vmatprep.subr.bf16.mxu1 %v2219_v56  ;;  %v2218_v53 = vpack.c.bf16 %v2206_v50, %v2205_v41  ;;  %v3337_v41 = vld [vmem:[%s5175_s10 + $0x70] sm:$0xff]  ;;  %v1163_v50 = vld [vmem:[%s5175_s10 + $0x38] sm:$0xff] }
 0x73e   : > { %3906 = vmatpush3.bf16.msra.mxu1 %v2219_v56  ;;  %v3440_v56 = vld [vmem:[%s5173_s8 + $0xe8] sm:$0xff] }
 0x73f   : > { %3907 = vmatprep.subr.bf16.mxu1 %v2218_v53 }
 0x742   : > { %3908 = vmatpush3.bf16.msra.mxu1 %v2218_v53  ;;  %v3405_v53 = vld [vmem:[%s5175_s10 + $0xb0] sm:$0xff] }
 0x743   : > { %3917 = vmatprep.subr.bf16.mxu1 %v4099_v14 }
 0x745   : > { %3910 = vmatmul.mubr.msk.bf16.vlgmr.msra.gmra.mxu1 %vm1224_vm4, %v4096_v51  ;;  %v3338_v51 = vld [vmem:[%s5175_s10 + $0x78] sm:$0xff] }
 0x746   : > { %3913 = vmatprep.mubr.msk.bf16.mxu1 %vm1224_vm4, %v4097_v52  ;;  %3918 = vmatpush3.bf16.msra.mxu1 %v4099_v14  ;;  %v1160_v52 = vld [vmem:[%s5175_s10 + $0x20] sm:$0xff] }
 0x747   : > { %3919 = vmatprep.subr.bf16.mxu1 %v4100_v31 }
 0x74a   : > { %3920 = vmatpush3.bf16.msra.mxu1 %v4100_v31 }
 0x74d   : > { %3914 = vmatmul.mubr.msk.bf16.gmra.mxu1 %vm1224_vm4, %v4098_v55  ;;  %v3406_v55 = vld [vmem:[%s5175_s10 + $0xb8] sm:$0xff] }
 0x74e   : > { %3933 = vmatprep.mubr.bf16.mxu1 %v4107_v48 }
 0x805   : > { %v3911_v18 = vpop.f32.mrf.mxu1 }
 0x806   : > { %v2344_v0 = vadd.f32 %v3911_v18, %v2242_v63  ;;  %v1161_v63 = vld [vmem:[%s5175_s10 + $0x28] sm:$0xff] }
 0x807   : > { %v2335_v2 = vpop.f32.mrf.mxu1  ;;  %v3336_v18 = vld [vmem:[%s5175_s10 + $0x68] sm:$0xff] }
 0x808   : > { %v2368_v3 = vmul.f32 %v4876_v47, %v2344_v0  ;;  %v2336_v4 = vadd.f32 %v2335_v2, %v2232_v1  ;;  %v3403_v0 = vld [vmem:[%s5175_s10 + $0xa0] sm:$0xff]  ;;  %v3474_v1 = vld [vmem:[%s5175_s10 + $0xf8] sm:$0xff]  ;;  %v3404_v2 = vld [vmem:[%s5175_s10 + $0xa8] sm:$0xff] }
 0x809   : > { %v3912_v5 = vpop.f32.mrf.mxu1 }
 0x80a   : > { %v2366_v8 = vmul.f32 %v4876_v47, %v2336_v4  ;;  %v2347_v9 = vadd.f32 %v3912_v5, %v2247_v62  ;;  %v2376_v10 = vadd.f32 %v2368_v3, %v4778_v32  ;;  %v3335_v62 = vld [vmem:[%s5175_s10 + $0x60] sm:$0xff]  ;;  %v3472_v4 = vld [vmem:[%s5175_s10 + $0xe8] sm:$0xff]  ;;  %v2910_v5 = vld [vmem:[%s5177_s12 + $0x10] sm:$0xff] }
 0x80b   : > { %v2338_v11 = vpop.f32.mrf.mxu1  ;;  %v3471_v3 = vld [vmem:[%s5175_s10 + $0xe0] sm:$0xff] }
 0x80c   : > { %v2369_v19 = vmul.f32 %v4876_v47, %v2347_v9  ;;  %v2339_v20 = vadd.f32 %v2338_v11, %v2237_v17  ;;  %v2380_v22 = vmul.f32 0.70710677, %v2376_v10  ;;  %v2374_v25 = vadd.f32 %v2366_v8, %v4784_v21  ;;  %v2392_v21 = vpop.permute.xlu0 %2391  ;;  %v3473_v17 = vld [vmem:[%s5175_s10 + $0xf0] sm:$0xff]  ;;  %v2908_v8 = vld [vmem:[%s5177_s12] sm:$0xff]  ;;  %v2909_v9 = vld [vmem:[%s5177_s12 + $0x8] sm:$0xff] }
 0x80d   : > { %v3008_v10 = vld [vmem:[%s5179_s14] sm:$0xff] }
 0x80e   : > { %v2377_v26 = vadd.f32 %v2369_v19, %v4786_v40  ;;  %v2367_v27 = vmul.f32 %v4876_v47, %v2339_v20  ;;  %v2404_v24 = vadd.f32 %v2396_v12, %v2380_v22  ;;  %v2378_v28 = vmul.f32 0.70710677, %v2374_v25 }
 0x810   : > { %v2381_v32 = vmul.f32 0.70710677, %v2377_v26  ;;  %2462 = vrot.lane.b32.xlu1 %v2404_v24, %s4309_s25  ;;  %v2375_v33 = vadd.f32 %v2367_v27, %v4792_v43  ;;  %v2402_v35 = vadd.f32 %v2388_v29, %v2378_v28  ;;  %v3437_v43 = vld [vmem:[%s5173_s8 + $0xd0] sm:$0xff] }
 0x812   : > { %v2405_v34 = vadd.f32 %v2400_v7, %v2381_v32  ;;  %v2379_v36 = vmul.f32 0.70710677, %v2375_v33  ;;  %v2911_v7 = vld [vmem:[%s5177_s12 + $0x18] sm:$0xff] }
 0x814   : > { %v3675_v38 = vpack.c.bf16 %v2405_v34, %v2404_v24  ;;  %v2403_v40 = vadd.f32 %v2392_v21, %v2379_v36  ;;  %2464 = vrot.lane.b32.xlu0 %v2405_v34, %s4309_s25  ;;  %2458 = vrot.lane.b32.xlu1 %v2402_v35, %s4309_s25 }
 0x816   : > { %3717 = vst [vmem:[#allocation6 + $0x18] sm:$0xff] %v3675_v38   ;;  %v3670_v44 = vpack.c.bf16 %v2403_v40, %v2402_v35 }
 0x818   : > { %3716 = vst [vmem:[#allocation6 + $0x10] sm:$0xff] %v3670_v44   ;;  %2460 = vrot.lane.b32.xlu0 %v2403_v40, %s4309_s25  ;;  %2430 = vrot.lane.b32.xlu1 %v2404_v24, %s5206_s22  ;;  %s3060_s25 = scalar_lea.sflag [#allocation9], %s5212_s21 }
 0x81c   : > { %2432 = vrot.lane.b32.xlu0 %v2405_v34, %s5206_s22  ;;  %2426 = vrot.lane.b32.xlu1 %v2402_v35, %s5206_s22 }
 0x81d   : > { %v4103_v44 = vld [vmem:[#allocation6 + $0x18] sm:$0xff]  }
 0x820   : > { %2428 = vrot.lane.b32.xlu0 %v2403_v40, %s5206_s22  ;;  %2536 = vperm.xlu1 %4047, %v3437_v43   ;;  %v4104_v43 = vld [vmem:[#allocation6 + $0x10] sm:$0xff]   ;;  %s5209_s22 = scalar_lea.vmem [#allocation8], %s4454_s24 }
 0x821   : > { %s3074_s15 = sshll.u32 %s5209_s22, 4  ;;  %s5211_s17 = smov %s5209_s22  ;;  %s5117_s15 = int_to_ptr.vmem [resolvable:$true] %s3074_s15 }
 0x822   : > { %s4218_s18 = scalar_lea.vmem %s5117_s15, 128  ;;  %p4225_p1 = scmp.lt.s32.totalorder %s5117_s15, %s4223_s20 }
 0x823   : > { %p4219_p12 = scmp.ne.s32.totalorder %s5117_s15, %s4218_s18 }
 0x824   : > { %2541 = vperm.xlu0 %4048, %v3438_v39   ;;  %2526 = vperm.xlu1 %4047, %v3435_v42  }
 0x825   : > { %p4220_p13 = pnand %p4219_p12, %p4435_p4 }
 0x827   : > { %p4221_p0 = pneg %p4220_p13 }
 0x828   : > { %2556 = vperm.xlu0 %4048, %v3441_v46   ;;  %2531 = vperm.xlu1 %4047, %v3436_v54   ;;  %v4109_v46 = vld [vmem:[%s5172_s7 + $0x70] sm:$0xff]   ;;  %v4110_v54 = vld [vmem:[%s5172_s7 + $0x78] sm:$0xff]  }
 0x82c   : > { %2546 = vperm.xlu0 %4048, %v3439_v37   ;;  %2561 = vperm.xlu1 %4047, %v3442_v45   ;;  %v4111_v37 = vld [vmem:[%s5174_s9 + $0x60] sm:$0xff]   ;;  %v5034_v45 = vpop.f32.mrf.mxu1 }
 0x82d   : > { %3945 = vmatprep.mubr.msk.bf16.mxu0 %vm1224_vm4, %v4111_v37 }
 0x82e   : > { %v5036_v48 = vpop.f32.mrf.mxu1 }
 0x830   : > { %1196 = vperm.xlu0 %4048, %v1162_v49   ;;  %2551 = vperm.xlu1 %4047, %v3440_v56   ;;  %v5038_v56 = vpop.f32.mrf.mxu1 }
 0x834   : > { %1729 = vperm.xlu0 %4048, %v3337_v41   ;;  %1201 = vperm.xlu1 %4047, %v1163_v50   ;;  %v5040_v41 = vpop.f32.mrf.mxu1 }
 0x838   : > { %2261 = vperm.xlu0 %4048, %v3405_v53   ;;  %1734 = vperm.xlu1 %4047, %v3338_v51  }
 0x83c   : > { %1186 = vperm.xlu0 %4048, %v1160_v52   ;;  %2266 = vperm.xlu1 %4047, %v3406_v55  }
 0x840   : > { %1719 = vperm.xlu0 %4048, %v3335_v62   ;;  %1191 = vperm.xlu1 %4047, %v1161_v63  }
 0x844   : > { %2789 = vperm.xlu0 %4048, %v3473_v17   ;;  %1724 = vperm.xlu1 %4047, %v3336_v18  }
 0x848   : > { %2251 = vperm.xlu0 %4048, %v3403_v0   ;;  %2794 = vperm.xlu1 %4047, %v3474_v1  }
 0x84c   : > { %2256 = vperm.xlu1 %4047, %v3404_v2   ;;  %2779 = vperm.xlu0 %4048, %v3471_v3  }
 0x850   : > { %2784 = vperm.xlu1 %4047, %v3472_v4   ;;  %2924 = vperm.xlu0 %4048, %v2910_v5  }
 0x854   : > { %2929 = vperm.xlu1 %4047, %v2911_v7   ;;  %2914 = vperm.xlu0 %4048, %v2908_v8  }
 0x858   : > { %2919 = vperm.xlu1 %4047, %v2909_v9   ;;  %3011 = vperm.xlu0 %4048, %v3008_v10  }
 0x882   : > { %v2463_v11 = vpop.permute.xlu1 %2462 }
 0x883   : > { %v2468_v19 = vmul.f32 %v4721_v13, %v2463_v11 }
 0x886   : > { %v2465_v12 = vpop.permute.xlu0 %2464  ;;  %v2459_v14 = vpop.permute.xlu1 %2458 }
 0x887   : > { %v2469_v20 = vmul.f32 %v4721_v13, %v2465_v12  ;;  %v2466_v27 = vmul.f32 %v4721_v13, %v2459_v14 }
 0x889   : > { %v3695_v22 = vpack.c.bf16 %v2469_v20, %v2468_v19 }
 0x88a   : > { %v2461_v25 = vpop.permute.xlu0 %2460  ;;  %v2431_v26 = vpop.permute.xlu1 %2430 }
 0x88b   : > { %3720 = vst [vmem:[#allocation6 + $0x28] sm:$0xff] %v3695_v22   ;;  %v2467_v24 = vmul.f32 %v4721_v13, %v2461_v25  ;;  %v2436_v31 = vmul.f32 %v4729_v30, %v2431_v26 }
 0x88d   : > { %v3690_v28 = vpack.c.bf16 %v2467_v24, %v2466_v27 }
 0x88e   : > { %v2433_v29 = vpop.permute.xlu0 %2432  ;;  %v2427_v33 = vpop.permute.xlu1 %2426 }
 0x88f   : > { %3719 = vst [vmem:[#allocation6 + $0x20] sm:$0xff] %v3690_v28   ;;  %v2437_v32 = vmul.f32 %v4729_v30, %v2433_v29  ;;  %v2434_v21 = vmul.f32 %v4729_v30, %v2427_v33 }
 0x891   : > { %v3685_v34 = vpack.c.bf16 %v2437_v32, %v2436_v31 }
 0x892   : > { %v2429_v35 = vpop.permute.xlu0 %2428  ;;  %v4101_v36 = vld [vmem:[#allocation6 + $0x28] sm:$0xff]  }
 0x893   : > { %3718 = vst [vmem:[#allocation6 + $0x8] sm:$0xff] %v3685_v34   ;;  %v2435_v38 = vmul.f32 %v4729_v30, %v2429_v35  ;;  %3921 = vmatprep.subr.bf16.mxu1 %v4101_v36  ;;  %v4108_v30 = vld [vmem:[%s5172_s7 + $0x68] sm:$0xff]  }
 0x894   : > { %3922 = vmatpush3.bf16.msra.mxu1 %v4101_v36 }
 0x895   : > { %v3680_v40 = vpack.c.bf16 %v2435_v38, %v2434_v21 }
 0x896   : > { %v4102_v13 = vld [vmem:[#allocation6 + $0x20] sm:$0xff]  }
 0x897   : > { %3681 = vst [vmem:[#allocation6] sm:$0xff] %v3680_v40   ;;  %3923 = vmatprep.subr.bf16.mxu1 %v4102_v13 }
 0x898   : > { %3924 = vmatpush3.bf16.msra.mxu1 %v4102_v13 }
 0x899   : > { %3925 = vmatprep.subr.bf16.mxu1 %v4103_v44 }
 0x89a   : > { %v4105_v39 = vld [vmem:[#allocation6 + $0x8] sm:$0xff]  }
 0x89b   : > { %v2537_v49 = vpop.permute.xlu1 %2536 }
 0x89c   : > { %3926 = vmatpush3.bf16.msra.mxu1 %v4103_v44 }
 0x89d   : > { %3927 = vmatprep.subr.bf16.mxu1 %v4104_v43 }
 0x89e   : > { %v4106_v42 = vld [vmem:[#allocation6] sm:$0xff]  }
 0x89f   : > { %v2527_v50 = vpop.permute.xlu1 %2526  ;;  %v2542_v52 = vpop.permute.xlu0 %2541 }
 0x8a0   : > { %3928 = vmatpush3.bf16.msra.mxu1 %v4104_v43 }
 0x8a1   : > { %3929 = vmatprep.subr.bf16.mxu1 %v4105_v39 }
 0x8a3   : > { %v2532_v2 = vpop.permute.xlu1 %2531  ;;  %v2557_v8 = vpop.permute.xlu0 %2556 }
 0x8a4   : > { %3930 = vmatpush3.bf16.msra.mxu1 %v4105_v39 }
 0x8a5   : > { %3931 = vmatprep.subr.bf16.mxu1 %v4106_v42 }
 0x8a7   : > { %v2562_v19 = vpop.permute.xlu1 %2561  ;;  %v2547_v22 = vpop.permute.xlu0 %2546 }
 0x8a8   : > { %3932 = vmatpush3.bf16.msra.mxu1 %v4106_v42 }
 0x8a9   : > { %3961 = vmatprep.subr.bf16.mxu1 %v4307_v23 }
 0x8ab   : > { %3934 = vmatmul.mubr.bf16.vlgmr.msra.gmra.mxu1 %v4108_v30  ;;  %v2552_v29 = vpop.permute.xlu1 %2551 }
 0x8ac   : > { %3937 = vmatprep.mubr.bf16.mxu1 %v4109_v46 }
 0x8b3   : > { %3938 = vmatmul.mubr.bf16.gmra.mxu1 %v4110_v54 }
 0x8b4   : > { %3965 = vmatprep.mubr.msk.bf16.mxu1 %vm4313_vm7, %v4307_v23 }
 0x96b   : > { %v3935_v53 = vpop.f32.mrf.mxu1 }
 0x96c   : > { %v2679_v51 = vadd.f32 %v3935_v53, %v2537_v49 }
 0x96d   : > { %v2670_v55 = vpop.f32.mrf.mxu1 }
 0x96e   : > { %v2703_v62 = vmul.f32 %v4876_v47, %v2679_v51  ;;  %v2671_v63 = vadd.f32 %v2670_v55, %v2527_v50 }
 0x96f   : > { %v3936_v17 = vpop.f32.mrf.mxu1 }
 0x970   : > { %v3457_v18 = vmul.f32 -1.442695, %v2703_v62  ;;  %v2701_v0 = vmul.f32 %v4876_v47, %v2671_v63  ;;  %v2682_v1 = vadd.f32 %v3936_v17, %v2542_v52  ;;  %v4112_v17 = vld [vmem:[%s5174_s9 + $0x68] sm:$0xff]  }
 0x971   : > { %v2673_v3 = vpop.f32.mrf.mxu1 }
 0x972   : > { %4189 = vpow2.f32 %v3457_v18  ;;  %v3455_v4 = vmul.f32 -1.442695, %v2701_v0  ;;  %v2704_v5 = vmul.f32 %v4876_v47, %v2682_v1  ;;  %v2674_v7 = vadd.f32 %v2673_v3, %v2532_v2  ;;  %v4113_v18 = vld [vmem:[%s5174_s9 + $0x70] sm:$0xff]   ;;  %v4114_v0 = vld [vmem:[%s5174_s9 + $0x78] sm:$0xff]   ;;  %v4115_v1 = vld [vmem:[%s5176_s11] sm:$0xff]   ;;  %v1197_v2 = vpop.permute.xlu0 %1196  ;;  %v1202_v3 = vpop.permute.xlu1 %1201 }
 0x973   : > { %v3939_v9 = vpop.f32.mrf.mxu1 }
 0x974   : > { %4191 = vpow2.f32 %v3455_v4  ;;  %v3458_v10 = vmul.f32 -1.442695, %v2704_v5  ;;  %v2702_v11 = vmul.f32 %v4876_v47, %v2674_v7  ;;  %v2695_v25 = vadd.f32 %v3939_v9, %v2557_v8 }
 0x975   : > { %v2686_v12 = vpop.f32.mrf.mxu1 }
 0x976   : > { %4193 = vpow2.f32 %v3458_v10  ;;  %v3456_v14 = vmul.f32 -1.442695, %v2702_v11  ;;  %v2687_v26 = vadd.f32 %v2686_v12, %v2547_v22  ;;  %v2707_v28 = vmul.f32 %v4876_v47, %v2695_v25  ;;  %v1730_v4 = vpop.permute.xlu0 %1729  ;;  %v1735_v5 = vpop.permute.xlu1 %1734 }
 0x977   : > { %v3940_v20 = vpop.f32.mrf.mxu1  ;;  %v1828_v22 = vadd.f32 %v4898_v61, %v1730_v4 }
 0x978   : > { %4195 = vpow2.f32 %v3456_v14  ;;  %v2698_v27 = vadd.f32 %v3940_v20, %v2562_v19  ;;  %v2705_v31 = vmul.f32 %v4876_v47, %v2687_v26  ;;  %v1296_v26 = vadd.f32 %v4754_v58, %v1197_v2 }
 0x979   : > { %v2689_v24 = vpop.f32.mrf.mxu1  ;;  %4197 = vtanh.f32 %v2707_v28 }
 0x97a   : > { %v2708_v33 = vmul.f32 %v4876_v47, %v2698_v27  ;;  %v2690_v34 = vadd.f32 %v2689_v24, %v2552_v29  ;;  %4199 = vtanh.f32 %v2705_v31  ;;  %v2262_v7 = vpop.permute.xlu0 %2261  ;;  %v2267_v8 = vpop.permute.xlu1 %2266  ;;  %v1831_v24 = vadd.f32 %v4902_v15, %v1735_v5 }
 0x97b   : > { %v2360_v27 = vadd.f32 %v5034_v45, %v2262_v7  ;;  %v1308_v15 = vmul.f32 %v4876_v47, %v1296_v26 }
 0x97c   : > { %4201 = vtanh.f32 %v2708_v33  ;;  %v2706_v40 = vmul.f32 %v4876_v47, %v2690_v34  ;;  %v1299_v33 = vadd.f32 %v4758_v57, %v1202_v3  ;;  %v2363_v34 = vadd.f32 %v5038_v56, %v2267_v8 }
 0x97e   : > { %v1187_v9 = vpop.permute.xlu0 %1186  ;;  %v1192_v10 = vpop.permute.xlu1 %1191 }
 0x97f   : > { %v4190_v32 = vpop.eup %4189  ;;  %v1288_v58 = vadd.f32 %v4756_v60, %v1187_v9  ;;  %v2373_v60 = vmul.f32 %v4876_v47, %v2363_v34 }
 0x980   : > { %v2723_v35 = vadd.f32 1.0, %v4190_v32  ;;  %v1840_v32 = vmul.f32 %v4876_v47, %v1828_v22 }
 0x981   : > { %v4192_v36 = vpop.eup %4191 }
 0x982   : > { %v2721_v21 = vadd.f32 1.0, %v4192_v36  ;;  %4203 = vrcp.f32 %v2723_v35  ;;  %v1720_v11 = vpop.permute.xlu0 %1719  ;;  %v1725_v12 = vpop.permute.xlu1 %1724 }
 0x983   : > { %v4194_v38 = vpop.eup %4193  ;;  %v1820_v31 = vadd.f32 %v4900_v16, %v1720_v11  ;;  %v1823_v35 = vadd.f32 %v4904_v6, %v1725_v12  ;;  %v1841_v16 = vmul.f32 %v4876_v47, %v1831_v24 }
 0x984   : > { %v2724_v13 = vadd.f32 1.0, %v4194_v38  ;;  %4205 = vrcp.f32 %v2721_v21  ;;  %v2372_v21 = vmul.f32 %v4876_v47, %v2360_v27  ;;  %v1291_v38 = vadd.f32 %v4760_v59, %v1192_v10 }
 0x985   : > { %v4196_v44 = vpop.eup %4195  ;;  %v1838_v57 = vmul.f32 %v4876_v47, %v1820_v31 }
 0x986   : > { %4207 = vrcp.f32 %v2724_v13  ;;  %v2722_v43 = vadd.f32 1.0, %v4196_v44  ;;  %v4198_v39 = vpop.eup %4197  ;;  %v2790_v14 = vpop.permute.xlu0 %2789  ;;  %v1852_v13 = vadd.f32 %v1840_v32, %v1308_v15  ;;  %v1309_v44 = vmul.f32 %v4876_v47, %v1299_v33 }
 0x987   : > { %4209 = vtanh.f32 %v2706_v40  ;;  %v4200_v42 = vpop.eup %4199  ;;  %v2795_v19 = vpop.permute.xlu1 %2794 }
 0x988   : > { %4211 = vrcp.f32 %v2722_v43 }
 0x989   : > { %v4202_v30 = vpop.eup %4201 }
 0x98a   : > { %v2252_v28 = vpop.permute.xlu0 %2251 }
 0x98b   : > { %v2257_v61 = vpop.permute.xlu1 %2256  ;;  %v2352_v45 = vadd.f32 %v5036_v48, %v2252_v28  ;;  %v1839_v48 = vmul.f32 %v4876_v47, %v1823_v35 }
 0x98c   : > { %v2355_v56 = vadd.f32 %v5040_v41, %v2257_v61  ;;  %v1307_v41 = vmul.f32 %v4876_v47, %v1291_v38 }
 0x98e   : > { %v2780_v43 = vpop.permute.xlu0 %2779 }
 0x98f   : > { %v4204_v46 = vpop.eup %4203 }
 0x990   : > { %v2739_v50 = vmul.f32 %v4204_v46, %v4198_v39 }
 0x991   : > { %v4206_v54 = vpop.eup %4205 }
 0x992   : > { %v2737_v55 = vmul.f32 %v4206_v54, %v4200_v42  ;;  %v1306_v42 = vmul.f32 %v4876_v47, %v1288_v58  ;;  %v2384_v54 = vadd.f32 %v2372_v21, %v1852_v13  ;;  %v2925_v22 = vpop.permute.xlu0 %2924 }
 0x993   : > { %v4208_v37 = vpop.eup %4207 }
 0x994   : > { %v4210_v49 = vpop.eup %4209  ;;  %v2740_v53 = vmul.f32 %v4208_v37, %v4202_v30  ;;  %v2370_v30 = vmul.f32 %v4876_v47, %v2352_v45  ;;  %v1853_v37 = vadd.f32 %v1841_v16, %v1309_v44 }
 0x995   : > { %v4212_v51 = vpop.eup %4211 }
 0x996   : > { %v2751_v52 = vpack.c.bf16 %v2740_v53, %v2739_v50  ;;  %v2738_v62 = vmul.f32 %v4212_v51, %v4210_v49  ;;  %v1850_v50 = vadd.f32 %v1838_v57, %v1306_v42  ;;  %v2371_v53 = vmul.f32 %v4876_v47, %v2355_v56  ;;  %v2915_v28 = vpop.permute.xlu0 %2914  ;;  %v3005_v56 = vld [vmem:[%s5207_s29] sm:$0xf]  ;;  %s4224_s29 = scalar_lea.vmem %s4223_s20, 256 }
 0x997   : > { %p4226_p2 = scmp.lt.s32.totalorder %s4224_s29, %s4218_s18 }
 0x998   : > { %3941 = vmatprep.subr.bf16.mxu0 %v2751_v52  ;;  %v2750_v63 = vpack.c.bf16 %v2738_v62, %v2737_v55  ;;  %v2385_v55 = vadd.f32 %v2373_v60, %v1853_v37  ;;  %v1851_v62 = vadd.f32 %v1839_v48, %v1307_v41 }
 0x999   : > { %3942 = vmatpush3.bf16.msra.mxu0 %v2751_v52  ;;  %p4227_p3 = por %p4226_p2, %p4225_p1 }
 0x99a   : > { %3943 = vmatprep.subr.bf16.mxu0 %v2750_v63  ;;  %v2383_v3 = vadd.f32 %v2371_v53, %v1851_v62 }
 0x99b   : > { %p4228_p5 = pnand %p4227_p3, %p4221_p0 }
 0x99d   : > { %3944 = vmatpush3.bf16.msra.mxu0 %v2750_v63  ;;  %v2785_v63 = vpop.permute.xlu1 %2784 }
 0x9a0   : > { %3946 = vmatmul.mubr.msk.bf16.vlgmr.msra.gmra.mxu0 %vm1224_vm4, %v4112_v17 }
 0x9a1   : > { %3949 = vmatprep.mubr.msk.bf16.mxu0 %vm1224_vm4, %v4113_v18  ;;  %v2382_v18 = vadd.f32 %v2370_v30, %v1850_v50 }
 0x9a8   : > { %3950 = vmatmul.mubr.msk.bf16.gmra.mxu0 %vm1224_vm4, %v4114_v0 }
 0x9a9   : > { %3957 = vmatprep.mubr.msk.bf16.mxu0 %vm1224_vm4, %v4115_v1 }
 0xa60   : > { %v3947_v20 = vpop.f32.mrf.mxu0 }
 0xa61   : > { %v4116_v20 = vld [vmem:[%s5176_s11 + $0x8] sm:$0xff]  }
 0xa62   : > { %v2863_v25 = vpop.f32.mrf.mxu0 }
 0xa63   : > { %v2930_v25 = vpop.permute.xlu1 %2929 }
 0xa64   : > { %v3948_v29 = vpop.f32.mrf.mxu0 }
 0xa66   : > { %v2865_v36 = vpop.f32.mrf.mxu0 }
 0xa67   : > { %v2920_v34 = vpop.permute.xlu1 %2919 }
 0xa68   : > { %v3951_v40 = vpop.f32.mrf.mxu0 }
 0xa69   : > { %v2884_v6 = vadd.f32 %v3951_v40, %v2790_v14 }
 0xa6a   : > { %v2875_v39 = vpop.f32.mrf.mxu0 }
 0xa6b   : > { %v2892_v59 = vmul.f32 %v4876_v47, %v2884_v6  ;;  %v2876_v46 = vadd.f32 %v2875_v39, %v2780_v43  ;;  %v3012_v6 = vpop.permute.xlu0 %3011 }
 0xa6c   : > { %v3952_v49 = vpop.f32.mrf.mxu0 }
 0xa6d   : > { %v2890_v51 = vmul.f32 %v4876_v47, %v2876_v46  ;;  %v2887_v52 = vadd.f32 %v3952_v49, %v2795_v19  ;;  %v2896_v0 = vadd.f32 %v2892_v59, %v2384_v54 }
 0xa6e   : > { %v2878_v17 = vpop.f32.mrf.mxu0 }
 0xa6f   : > { %v2893_v1 = vmul.f32 %v4876_v47, %v2887_v52  ;;  %v2879_v2 = vadd.f32 %v2878_v17, %v2785_v63  ;;  %v2894_v4 = vadd.f32 %v2890_v51, %v2382_v18  ;;  %v2900_v8 = vmul.f32 0.5, %v2896_v0 }
 0xa71   : > { %v2897_v5 = vadd.f32 %v2893_v1, %v2385_v55  ;;  %v2891_v7 = vmul.f32 %v4876_v47, %v2879_v2  ;;  %v2898_v11 = vmul.f32 0.5, %v2894_v4 }
 0xa73   : > { %v2901_v9 = vmul.f32 0.5, %v2897_v5  ;;  %v2895_v10 = vadd.f32 %v2891_v7, %v2383_v3 }
 0xa75   : > { %v2899_v12 = vmul.f32 0.5, %v2895_v10  ;;  %v2907_v14 = vpack.c.bf16 %v2901_v9, %v2900_v8 }
 0xa77   : > { %3953 = vmatprep.subr.bf16.mxu0 %v2907_v14  ;;  %v2906_v19 = vpack.c.bf16 %v2899_v12, %v2898_v11 }
 0xa78   : > { %3954 = vmatpush3.bf16.msra.mxu0 %v2907_v14 }
 0xa79   : > { %3955 = vmatprep.subr.bf16.mxu0 %v2906_v19 }
 0xa7c   : > { %3956 = vmatpush3.bf16.msra.mxu0 %v2906_v19 }
 0xa7f   : > { %3958 = vmatmul.mubr.msk.bf16.vlgmr.msra.gmra.mxu0 %vm1224_vm4, %v4116_v20 }
 0xb3f   : > { %v3959_v26 = vpop.f32.mrf.mxu0 }
 0xb40   : > { %v2991_v27 = vadd.f32 %v3959_v26, %v2925_v22 }
 0xb41   : > { %v2982_v24 = vpop.f32.mrf.mxu0 }
 0xb42   : > { %v2999_v31 = vmul.f32 %v4876_v47, %v2991_v27  ;;  %v2983_v32 = vadd.f32 %v2982_v24, %v2915_v28 }
 0xb43   : > { %v3960_v29 = vpop.f32.mrf.mxu0 }
 0xb44   : > { %v2994_v33 = vadd.f32 %v3960_v29, %v2930_v25  ;;  %v3003_v58 = vmax.f32 %v2999_v31, 0.0  ;;  %v2997_v45 = vmul.f32 %v4876_v47, %v2983_v32 }
 0xb45   : > { %v2985_v35 = vpop.f32.mrf.mxu0 }
 0xb46   : > { %v3000_v61 = vmul.f32 %v4876_v47, %v2994_v33  ;;  %v2986_v36 = vadd.f32 %v2985_v35, %v2920_v34  ;;  %v3001_v40 = vmax.f32 %v2997_v45, 0.0 }
 0xb48   : > { %v3004_v15 = vmax.f32 %v3000_v61, 0.0  ;;  %v2998_v21 = vmul.f32 %v4876_v47, %v2986_v36 }
 0xb4a   : > { %v3007_v16 = vpack.c.bf16 %v3004_v15, %v3003_v58  ;;  %v3002_v38 = vmax.f32 %v2998_v21, 0.0 }
 0xb4c   : > { %3962 = vmatpush3.bf16.msra.mxu1 %v3007_v16  ;;  %v3006_v57 = vpack.c.bf16 %v3002_v38, %v3001_v40 }
 0xb4d   : > { %3963 = vmatprep.subr.bf16.mxu1 %v4307_v23 }
 0xb50   : > { %3964 = vmatpush3.bf16.msra.mxu1 %v3006_v57 }
 0xb53   : > { %3966 = vmatmul.mubr.msk.bf16.vlgmr.msra.gmra.mxu1 %vm1224_vm4, %v3005_v56 }
 0xc13   : > { %v3051_v13 = vpop.f32.mrf.mxu1 }
 0xc14   : > { %v3052_v44 = vadd.f32 %v3051_v13, %v3012_v6 }
 0xc15   : > { %v3967_v60 = vpop.f32.mrf.mxu1 }
 0xc16   : > { %v3057_v48 = vmul.f32 %v4876_v47, %v3052_v44 }
 0xc17   : > { %v3054_v23 = vpop.f32.mrf.mxu1 }
 0xc18   : > { %3058 = vst [vmem:[%s5211_s17] sm:$0xff] %v3057_v48 }
 0xc19   : > { %v3968_v43 = vpop.f32.mrf.mxu1 }
 0xc1a   : > { %4231 = shalt.err (!%p4228_p5)
}
 0xc1b   : > { %s4232_s24 = scalar_lea.hbm %s5115_s28, 128  ;;  %s4236_s26 = scalar_lea.hbm %s5210_s16, 256 }
 0xc1c   : > { %p4233_p6 = scmp.ne.s32.totalorder %s5115_s28, %s4232_s24  ;;  %p4237_p10 = scmp.lt.s32.totalorder %s5115_s28, %s5210_s16 }
 0xc1d   : > { %p4238_p11 = scmp.lt.s32.totalorder %s4236_s26, %s4232_s24 }
 0xc1e   : > { %p4234_p7 = pnand %p4233_p6, %p4435_p4 }
 0xc1f   : > { %p4239_p12 = por %p4238_p11, %p4237_p10 }
 0xc20   : > { %p4235_p9 = pneg %p4234_p7 }
 0xc22   : > { %p4240_p13 = pnand %p4239_p12, %p4235_p9 }
 0xc24   : > { %4243 = shalt.err (!%p4240_p13)
}
 0xc25   : > { %3970 = dma.vmem_to_hbm [thread:$0]  (%p4435_p4), %s5117_s15, 128, %s5115_s28, %s3060_s25  }
 0xc26 PF: > { %s5213_s21 = sld [smem:[#allocation22_spill]] }
 0xc27   : > { %s5214_s18 = sld [smem:[#allocation19_spill]] }
 0xc2c   : > { %p3976_p0 = scmp.ge.s32.totalorder %s5213_s21, 2 }
 0xc2d   : > { %s3086_s20 = sand.u32 1, %s5214_s18  }
 0xc2e   : > { %p3973_p1 = pnand %p3976_p0, %p4442_p8  ;;  %s3087_s29 = scalar_lea.sflag [#allocation9], %s3086_s20 }
 0xc30   : > { %p3974_p2 = pneg %p3973_p1 }
 0xc32   : > { %4277 = dma.done.wait (%p3974_p2), %s3087_s29, 128  }
 0xc33   : > { %4279 = vsyncadd (%p3974_p2), %s3087_s29, 4294967168  ;;  %s28_s23 = sadd.s32 1, %s5213_s21   ;;  %s5216_s13 = sld [smem:[#allocation20_spill]] }
 0xc34   : > { %p25_p3 = scmp.ge.s32.totalorder %s28_s23, 4   ;;  %s5217_s20 = sld [smem:[#allocation26_spill]] }
 0xc35   : > { %s5218_s21 = sld [smem:[#allocation21_spill]]  ;;  %s5220_s18 = smov %s4286_s19 }
 0xc36   : > { %s5219_s22 = sld [smem:[#allocation23_spill]]  ;;  %27 = sbr.rel (!%p25_p3) target bundleno = 7 (0x7), region = 285 }
 0xc39   : > { %s5221_s19 = smov %s5216_s13 }
 0xc3b   :  { %3092 = vsyncpa [#allocation9], 1 }
 0xc3c   :  { %3094 = vsyncpa [#allocation9 + $0x1], 1 }
 0xc3d   :  { %3095 = vsyncmov [#allocation7] }
 0xc40   :  { %s3096_s15 = vpop.sfrf %3095 }
 0xc41   :  { %p3492_p4 = scmp.ne.s32.totalorder %s3096_s15, 0 }
 0xc43   :  { %3100 = shalt.err (%p3492_p4)  }
 0xc44   :  { %3102 = vsyncmov [#allocation7 + $0x1] }
 0xc47   :  { %s3103_s28 = vpop.sfrf %3102 }
 0xc48   :  { %p3493_p8 = scmp.ne.s32.totalorder %s3103_s28, 0 }
 0xc4a   :  { %3107 = shalt.err (%p3493_p8)  }
 0xc4b   :  { %3109 = vsyncmov [#allocation7 + $0x2] }
 0xc4e   :  { %s3110_s25 = vpop.sfrf %3109 }
 0xc4f   :  { %p3494_p5 = scmp.ne.s32.totalorder %s3110_s25, 0 }
 0xc51   :  { %3114 = shalt.err (%p3494_p5)  }
 0xc52   :  { %3116 = vsyncmov [#allocation7 + $0x3] }
 0xc55   :  { %s3117_s24 = vpop.sfrf %3116 }
 0xc56   :  { %p3495_p6 = scmp.ne.s32.totalorder %s3117_s24, 0 }
 0xc58   :  { %3121 = shalt.err (%p3495_p6)  }

</bundles_post_ra>
